<compile_context>
chip_gen: v7x
topology: tpu7x:2x2x1
jax: 0.10.0
libtpu: 0.0.40
codegen_flags: <defaults>
</compile_context>

<pallas_src>
import functools
import math

import jax
import jax.numpy as jnp
from jax import lax
from jax.experimental import pallas as pl
from jax.experimental.pallas import tpu as pltpu

# Safe on all generations (v7x has 64 MiB physical per TC).  Raise to ~64-96 MiB
# on v6e when growing tiles further.
_VMEM_LIMIT = 48 * 1024 * 1024


def _tile(dim, target, align):
    """Block size for `dim`: full dim if small, else the largest multiple of
    `align` <= target that evenly divides dim (fallback: full dim)."""
    if dim <= target:
        return dim
    t = (target // align) * align
    while t >= align:
        if dim % t == 0:
            return t
        t -= align
    return dim


# ----------------------------------------------------------------------------
# Kernel 1: fused QKV projection  qkv = x @ Wqkv + b, with RoPE (and the
#           1/sqrt(dh) scale folded into Q) applied in the finalize epilogue.
#           Grid (M_tiles, K_tiles); N = 3d kept whole per block.
# ----------------------------------------------------------------------------
def _qkv_rope_kernel(x_ref, w_ref, b_ref, cos_ref, sin_ref, o_ref, acc_ref,
                     *, d, n_heads, dh, scale, use_rope):
    @pl.when(pl.program_id(1) == 0)
    def _init():
        acc_ref[...] = jnp.zeros_like(acc_ref)

    xv = x_ref[...]
    wv = w_ref[...]
    if xv.dtype != wv.dtype:           # weights are pre-cast bf16; cast x tile only
        xv = xv.astype(wv.dtype)
    acc_ref[...] += jnp.dot(xv, wv, preferred_element_type=jnp.float32)

    @pl.when(pl.program_id(1) == pl.num_programs(1) - 1)
    def _finalize():
        y = acc_ref[...] + b_ref[...]                  # (tm, 3d) f32
        half = dh // 2

        def rope_heads(xd, cos_t, sin_t):
            # rotate-half per head as lane slice+concat (VPU/XLU), sign folded
            # into sin_t; no (dh, dh) permutation matmul.
            outs = []
            for h in range(n_heads):
                xh = xd[:, h * dh:(h + 1) * dh]
                rolled = jnp.concatenate([xh[:, half:], xh[:, :half]], axis=1)
                outs.append(xh * cos_t + rolled * sin_t)
            return jnp.concatenate(outs, axis=1)

        q = y[:, :d]
        k = y[:, d:2 * d]
        v = y[:, 2 * d:]
        if use_rope:
            cos_t = cos_ref[...]
            sin_t = sin_ref[...]
            q = rope_heads(q, cos_t * scale, sin_t * scale)   # scale folded into Q
            k = rope_heads(k, cos_t, sin_t)
        else:
            q = q * scale
        o_ref[...] = jnp.concatenate([q, k, v], axis=1).astype(o_ref.dtype)


def qkv_proj_rope(x2d, wqkv, bqkv, cos_full, sin_full, *, n_heads, use_rope,
                  out_dtype, tm=256, tk=512):
    M, K = x2d.shape
    N3 = wqkv.shape[1]
    d = N3 // 3
    dh = d // n_heads
    scale = 1.0 / math.sqrt(dh)
    tm = _tile(M, tm, 8)
    tk = _tile(K, tk, 128)
    grid = (M // tm, K // tk)
    return pl.pallas_call(
        functools.partial(_qkv_rope_kernel, d=d, n_heads=n_heads, dh=dh,
                          scale=scale, use_rope=use_rope),
        grid=grid,
        in_specs=[
            pl.BlockSpec((tm, tk), lambda i, k: (i, k)),
            pl.BlockSpec((tk, N3), lambda i, k: (k, 0)),
            pl.BlockSpec((1, N3), lambda i, k: (0, 0)),
            pl.BlockSpec((tm, dh), lambda i, k: (i, 0)),
            pl.BlockSpec((tm, dh), lambda i, k: (i, 0)),
        ],
        out_specs=pl.BlockSpec((tm, N3), lambda i, k: (i, 0)),
        out_shape=jax.ShapeDtypeStruct((M, N3), out_dtype),
        scratch_shapes=[pltpu.VMEM((tm, N3), jnp.float32)],
        compiler_params=pltpu.CompilerParams(
            dimension_semantics=("parallel", "arbitrary"),
            vmem_limit_bytes=_VMEM_LIMIT),
    )(x2d, wqkv, bqkv.reshape(1, N3), cos_full, sin_full)


# ----------------------------------------------------------------------------
# Kernel 2: tiled linear  y = x @ W + b  (optional ReLU), f32 accumulator
# ----------------------------------------------------------------------------
def _linear_kernel(x_ref, w_ref, b_ref, o_ref, acc_ref, *, relu):
    @pl.when(pl.program_id(2) == 0)
    def _init():
        acc_ref[...] = jnp.zeros_like(acc_ref)

    xv = x_ref[...]
    wv = w_ref[...]
    if xv.dtype != wv.dtype:
        xv = xv.astype(wv.dtype)
    acc_ref[...] += jnp.dot(xv, wv, preferred_element_type=jnp.float32)

    @pl.when(pl.program_id(2) == pl.num_programs(2) - 1)
    def _finalize():
        y = acc_ref[...] + b_ref[...]
        if relu:
            y = jnp.maximum(y, 0.0)
        o_ref[...] = y.astype(o_ref.dtype)


def linear(x2d, w, b, *, relu=False, out_dtype=None, tm=256, tn=1024, tk=512):
    M, K = x2d.shape
    N = w.shape[1]
    if out_dtype is None:
        out_dtype = x2d.dtype
    tm = _tile(M, tm, 8)
    tn = _tile(N, tn, 128)
    tk = _tile(K, tk, 128)
    grid = (M // tm, N // tn, K // tk)
    return pl.pallas_call(
        functools.partial(_linear_kernel, relu=relu),
        grid=grid,
        in_specs=[
            pl.BlockSpec((tm, tk), lambda i, j, k: (i, k)),
            pl.BlockSpec((tk, tn), lambda i, j, k: (k, j)),
            pl.BlockSpec((1, tn), lambda i, j, k: (0, j)),
        ],
        out_specs=pl.BlockSpec((tm, tn), lambda i, j, k: (i, j)),
        out_shape=jax.ShapeDtypeStruct((M, N), out_dtype),
        scratch_shapes=[pltpu.VMEM((tm, tn), jnp.float32)],
        compiler_params=pltpu.CompilerParams(
            dimension_semantics=("parallel", "parallel", "arbitrary"),
            vmem_limit_bytes=_VMEM_LIMIT),
    )(x2d, w, b.reshape(1, N))


# ----------------------------------------------------------------------------
# Kernel 3: tiled linear with fused epilogue:  y = LayerNorm(x @ W + b + resid)
#           (N kept whole per block so LN sees full rows)
# ----------------------------------------------------------------------------
def _linear_add_ln_kernel(x_ref, w_ref, b_ref, r_ref, g_ref, bt_ref, o_ref,
                          acc_ref, *, eps):
    @pl.when(pl.program_id(1) == 0)
    def _init():
        acc_ref[...] = jnp.zeros_like(acc_ref)

    xv = x_ref[...]
    wv = w_ref[...]
    if xv.dtype != wv.dtype:
        xv = xv.astype(wv.dtype)
    acc_ref[...] += jnp.dot(xv, wv, preferred_element_type=jnp.float32)

    @pl.when(pl.program_id(1) == pl.num_programs(1) - 1)
    def _finalize():
        h = acc_ref[...] + b_ref[...] + r_ref[...].astype(jnp.float32)
        mu = jnp.mean(h, axis=-1, keepdims=True)
        var = jnp.mean((h - mu) ** 2, axis=-1, keepdims=True)
        y = (h - mu) * lax.rsqrt(var + eps)
        o_ref[...] = (y * g_ref[...] + bt_ref[...]).astype(o_ref.dtype)


def linear_add_layernorm(x2d, w, b, resid, gamma, beta, *, eps=1e-6,
                         out_dtype=None, tm=128, tk=512):
    M, K = x2d.shape
    N = w.shape[1]
    if out_dtype is None:
        out_dtype = resid.dtype
    tm = _tile(M, tm, 8)
    tk = _tile(K, tk, 128)
    grid = (M // tm, K // tk)
    return pl.pallas_call(
        functools.partial(_linear_add_ln_kernel, eps=eps),
        grid=grid,
        in_specs=[
            pl.BlockSpec((tm, tk), lambda i, k: (i, k)),
            pl.BlockSpec((tk, N), lambda i, k: (k, 0)),
            pl.BlockSpec((1, N), lambda i, k: (0, 0)),
            pl.BlockSpec((tm, N), lambda i, k: (i, 0)),
            pl.BlockSpec((1, N), lambda i, k: (0, 0)),
            pl.BlockSpec((1, N), lambda i, k: (0, 0)),
        ],
        out_specs=pl.BlockSpec((tm, N), lambda i, k: (i, 0)),
        out_shape=jax.ShapeDtypeStruct((M, N), out_dtype),
        scratch_shapes=[pltpu.VMEM((tm, N), jnp.float32)],
        compiler_params=pltpu.CompilerParams(
            dimension_semantics=("parallel", "arbitrary"),
            vmem_limit_bytes=_VMEM_LIMIT),
    )(x2d, w, b.reshape(1, N), resid, gamma.reshape(1, N), beta.reshape(1, N))


# ----------------------------------------------------------------------------
# Kernel 4: flash-style causal MHA over the fused qkv tensor.
#   grid = (batch, q_tiles, kv_tiles); q/k/v blocks are column blocks 0/1/2 of
#   the (b, l, 3d) qkv tensor (no slicing in the wrapper).  RoPE + scale are
#   already baked into q/k by the QKV kernel.  Online softmax with per-head
#   (n_heads, tq, .) scratch slabs; mask built in-kernel (causal + key padding).
# ----------------------------------------------------------------------------
def _flash_mha_kernel(q_ref, k_ref, v_ref, mask_ref, o_ref,
                      m_sc, l_sc, acc_sc, *, n_heads, dh, tq, tkv):
    ki = pl.program_id(2)

    @pl.when(ki == 0)
    def _init():
        m_sc[...] = jnp.full_like(m_sc, -jnp.inf)
        l_sc[...] = jnp.zeros_like(l_sc)
        acc_sc[...] = jnp.zeros_like(acc_sc)

    q = q_ref[0]   # (tq, d), rope+scale already applied, act dtype (bf16)
    k = k_ref[0]   # (tkv, d)
    v = v_ref[0]   # (tkv, d)

    # causal + key-padding mask for this (q_tile, kv_tile), shared by all heads
    q_pos = pl.program_id(1) * tq + lax.broadcasted_iota(jnp.int32, (tq, tkv), 0)
    k_pos = ki * tkv + lax.broadcasted_iota(jnp.int32, (tq, tkv), 1)
    keep = (k_pos <= q_pos) & (mask_ref[0] > 0)        # (tq, tkv)

    # TODO(synk): for n_heads >> 8, bound this unroll with lax.fori_loop over
    # head slices (or a head grid axis) to limit vreg pressure.
    for h in range(n_heads):
        lo = h * dh
        q_h = q[:, lo:lo + dh]
        k_h = k[:, lo:lo + dh]
        v_h = v[:, lo:lo + dh]
        # contract last axes directly: no (tkv, dh) transposed copy per step
        s = lax.dot_general(q_h, k_h, (((1,), (1,)), ((), ())),
                            preferred_element_type=jnp.float32)     # (tq, tkv)
        s = jnp.where(keep, s, jnp.float32(-1e9))

        m_prev = m_sc[h]                                            # (tq, 1)
        m_new = jnp.maximum(m_prev, jnp.max(s, axis=-1, keepdims=True))
        alpha = jnp.exp(m_prev - m_new)
        p = jnp.exp(s - m_new)                                      # (tq, tkv)
        l_sc[h] = alpha * l_sc[h] + jnp.sum(p, axis=-1, keepdims=True)
        pv = jnp.dot(p.astype(v_h.dtype), v_h,
                     preferred_element_type=jnp.float32)            # (tq, dh)
        acc_sc[h] = alpha * acc_sc[h] + pv
        m_sc[h] = m_new

    @pl.when(ki == pl.num_programs(2) - 1)
    def _finalize():
        outs = []
        for h in range(n_heads):
            inv = pl.reciprocal(l_sc[h], approx=True)               # EUP slot
            outs.append(acc_sc[h] * inv)
        o_ref[0] = jnp.concatenate(outs, axis=-1).astype(o_ref.dtype)   # (tq, d)


def flash_mha(qkv3, key_mask3, *, n_heads, out_dtype, tq=256, tkv=256):
    """qkv3: (b, l, 3d) fused projection output; key_mask3: (b, 1, l) int32."""
    b, l, d3 = qkv3.shape
    d = d3 // 3
    dh = d // n_heads
    tq = _tile(l, tq, 8)
    tkv = _tile(l, tkv, 128)   # 128-aligned so the (1,1,tkv) mask block is lane-legal
    grid = (b, l // tq, l // tkv)
    kernel = functools.partial(_flash_mha_kernel, n_heads=n_heads, dh=dh,
                               tq=tq, tkv=tkv)
    return pl.pallas_call(
        kernel,
        grid=grid,
        in_specs=[
            # q / k / v are column blocks 0 / 1 / 2 of the same qkv tensor
            pl.BlockSpec((1, tq, d), lambda bb, qi, ki: (bb, qi, 0)),
            pl.BlockSpec((1, tkv, d), lambda bb, qi, ki: (bb, ki, 1)),
            pl.BlockSpec((1, tkv, d), lambda bb, qi, ki: (bb, ki, 2)),
            pl.BlockSpec((1, 1, tkv), lambda bb, qi, ki: (bb, 0, ki)),
        ],
        out_specs=pl.BlockSpec((1, tq, d), lambda bb, qi, ki: (bb, qi, 0)),
        out_shape=jax.ShapeDtypeStruct((b, l, d), out_dtype),
        scratch_shapes=[
            pltpu.VMEM((n_heads, tq, 1), jnp.float32),    # running max, per head
            pltpu.VMEM((n_heads, tq, 1), jnp.float32),    # running denom, per head
            pltpu.VMEM((n_heads, tq, dh), jnp.float32),   # running PV acc, per head
        ],
        compiler_params=pltpu.CompilerParams(
            dimension_semantics=("parallel", "parallel", "arbitrary"),
            vmem_limit_bytes=_VMEM_LIMIT),
    )(qkv3, qkv3, qkv3, key_mask3)


# ----------------------------------------------------------------------------
# Params / RoPE tables / forward glue
# ----------------------------------------------------------------------------
def init_params(key, d, d_ff, *, param_dtype=jnp.bfloat16):
    """Weights pre-cast to `param_dtype` (bf16) in HBM; biases / LN params f32."""
    ks = jax.random.split(key, 4)
    s = 0.02
    return dict(
        wqkv=(jax.random.normal(ks[0], (d, 3 * d), jnp.float32) * s).astype(param_dtype),
        bqkv=jnp.zeros((3 * d,), jnp.float32),
        wo=(jax.random.normal(ks[1], (d, d), jnp.float32) * s).astype(param_dtype),
        bo=jnp.zeros((d,), jnp.float32),
        g0=jnp.ones((d,), jnp.float32), beta0=jnp.zeros((d,), jnp.float32),
        w1=(jax.random.normal(ks[2], (d, d_ff), jnp.float32) * s).astype(param_dtype),
        b1=jnp.zeros((d_ff,), jnp.float32),
        w2=(jax.random.normal(ks[3], (d_ff, d), jnp.float32) * s).astype(param_dtype),
        b2=jnp.zeros((d,), jnp.float32),
        g1=jnp.ones((d,), jnp.float32), beta1=jnp.zeros((d,), jnp.float32),
    )


def rope_tables(l, dh):
    """cos table and sign-folded sin table so that
       rope(x) = x*cos + roll_half(x)*sin_signed   (rotate-half without matmul)."""
    half = dh // 2
    inv_freq = 1.0 / (10000.0 ** (jnp.arange(0, half, dtype=jnp.float32) / half))
    pos = jnp.arange(l, dtype=jnp.float32)
    freqs = pos[:, None] * inv_freq[None, :]                       # (l, dh/2)
    cos = jnp.concatenate([jnp.cos(freqs), jnp.cos(freqs)], -1)    # (l, dh)
    sin = jnp.sin(freqs)
    sin_signed = jnp.concatenate([-sin, sin], -1)                  # (l, dh)
    return cos, sin_signed


def decoder_layer_forward(params, x, x_mask, *, n_heads, use_rope=True,
                          act_dtype=jnp.bfloat16, tq=256, tkv=256):
    """x: (b, l, d) float32, x_mask: (b, l) {0,1} key-padding mask.
    Intermediate activations and MXU operands run in `act_dtype` (bf16 default,
    f32 accumulation everywhere); final output matches x.dtype.
    For v5e prefer tq=tkv=128."""
    b, l, d = x.shape
    dh = d // n_heads
    x2d = x.reshape(b * l, d)

    # per-flattened-row RoPE tables (tiny: (b*l, dh))
    cos_l, sin_l = rope_tables(l, dh)
    cos_full = jnp.tile(cos_l, (b, 1))
    sin_full = jnp.tile(sin_l, (b, 1))

    # fused QKV projection with RoPE (+ 1/sqrt(dh) folded into Q) in the epilogue
    qkv = qkv_proj_rope(x2d, params["wqkv"], params["bqkv"], cos_full, sin_full,
                        n_heads=n_heads, use_rope=use_rope, out_dtype=act_dtype)
    qkv3 = qkv.reshape(b, l, 3 * d)

    key_mask3 = x_mask.astype(jnp.int32).reshape(b, 1, l)
    attn = flash_mha(qkv3, key_mask3, n_heads=n_heads, out_dtype=act_dtype,
                     tq=tq, tkv=tkv)                                 # (b, l, d)

    # output proj + dropout(identity) + residual + LayerNorm, fused epilogue
    x1 = linear_add_layernorm(attn.reshape(b * l, d), params["wo"], params["bo"],
                              x2d, params["g0"], params["beta0"],
                              out_dtype=act_dtype)

    # FFN up + ReLU (bf16 hidden), then FFN down + residual + LayerNorm
    h = linear(x1, params["w1"], params["b1"], relu=True, out_dtype=act_dtype)
    y = linear_add_layernorm(h, params["w2"], params["b2"],
                             x1, params["g1"], params["beta1"],
                             out_dtype=x.dtype)
    return y.reshape(b, l, d)


# TODO(synk): nn.Dropout training-mode RNG masking is not implemented (inference no-op).

if __name__ == "__main__":
    # d chosen lane-aligned (128) so the qkv column-block trick is layout-legal.
    b, l, d, n_heads, d_ff = 2, 8, 128, 4, 256

    key = jax.random.PRNGKey(0)
    k_param, k_x = jax.random.split(key)
    params = init_params(k_param, d, d_ff)

    x = jax.random.normal(k_x, (b, l, d), jnp.float32)
    x_mask = jnp.ones((b, l), jnp.int32).at[1, -2:].set(0)  # pad last 2 tokens of batch 1

    fwd = jax.jit(functools.partial(decoder_layer_forward, n_heads=n_heads,
                                    use_rope=True))
    y = fwd(params, x, x_mask)
    jax.block_until_ready(y)
    assert y.shape == (b, l, d) and y.dtype == jnp.float32
    assert bool(jnp.isfinite(y).all())
    print("KERNEL_OK")
</pallas_src>

<mosaic_0001>
module attributes {stable_mosaic.version = 11 : i64} {
  func.func @_linear_add_ln_kernel(%arg0: i32, %arg1: i32, %arg2: memref<16x128xbf16, #tpu.memory_space<vmem>>, %arg3: memref<128x128xbf16, #tpu.memory_space<vmem>>, %arg4: memref<1x128xf32, #tpu.memory_space<vmem>>, %arg5: memref<16x128xf32, #tpu.memory_space<vmem>>, %arg6: memref<1x128xf32, #tpu.memory_space<vmem>>, %arg7: memref<1x128xf32, #tpu.memory_space<vmem>>, %arg8: memref<16x128xbf16, #tpu.memory_space<vmem>>, %arg9: memref<16x128xf32, #tpu.memory_space<vmem>>) attributes {dimension_semantics = [#tpu.dimension_semantics<parallel>, #tpu.dimension_semantics<arbitrary>], iteration_bounds = array<i64: 1, 1>, scalar_prefetch = 0 : i64, scratch_operands = 1 : i64, tpu.core_type = #tpu.core_type<tc>, window_params = [{transform_indices = @transform_0, window_bounds = array<i64: 16, 128>}, {transform_indices = @transform_1, window_bounds = array<i64: 128, 128>}, {pipeline_mode = #tpu.pipeline_mode<synchronous>, transform_indices = @transform_2, window_bounds = array<i64: 1, 128>}, {transform_indices = @transform_3, window_bounds = array<i64: 16, 128>}, {pipeline_mode = #tpu.pipeline_mode<synchronous>, transform_indices = @transform_4, window_bounds = array<i64: 1, 128>}, {pipeline_mode = #tpu.pipeline_mode<synchronous>, transform_indices = @transform_5, window_bounds = array<i64: 1, 128>}, {transform_indices = @transform_6, window_bounds = array<i64: 16, 128>}]} {
    %c0_i32 = arith.constant 0 : i32
    %0 = arith.cmpi eq, %arg1, %c0_i32 : i32
    %1 = arith.extui %0 : i1 to i32
    %c0_i32_0 = arith.constant 0 : i32
    %2 = arith.cmpi ne, %1, %c0_i32_0 : i32
    scf.if %2 {
      %cst_10 = arith.constant 0.000000e+00 : f32
      %12 = vector.broadcast %cst_10 : f32 to vector<16x128xf32>
      %c0_11 = arith.constant 0 : index
      %c0_12 = arith.constant 0 : index
      %13 = vector.load %arg9[%c0_11, %c0_12] : memref<16x128xf32, #tpu.memory_space<vmem>>, vector<16x128xf32>
      tpu.vector_store %arg9[%c0_11, %c0_12], %12 {strides = array<i32>} : memref<16x128xf32, #tpu.memory_space<vmem>>, vector<16x128xf32>,
    } else {
    }
    %c0 = arith.constant 0 : index
    %c0_1 = arith.constant 0 : index
    %3 = vector.load %arg2[%c0, %c0_1] : memref<16x128xbf16, #tpu.memory_space<vmem>>, vector<16x128xbf16>
    %c0_2 = arith.constant 0 : index
    %c0_3 = arith.constant 0 : index
    %4 = vector.load %arg3[%c0_2, %c0_3] : memref<128x128xbf16, #tpu.memory_space<vmem>>, vector<128x128xbf16>
    %c0_4 = arith.constant 0 : index
    %c0_5 = arith.constant 0 : index
    %5 = vector.load %arg9[%c0_4, %c0_5] : memref<16x128xf32, #tpu.memory_space<vmem>>, vector<16x128xf32>
    %cst = arith.constant dense<0.000000e+00> : vector<16x128xf32>
    %6 = tpu.matmul %3, %4, %cst {dimension_numbers = #tpu.dot_dimension_numbers<[1], [0], [0], [1], [0, 0, 1, 1], [], []>} : vector<16x128xbf16>, vector<128x128xbf16>, vector<16x128xf32> -> vector<16x128xf32>
    %7 = arith.addf %5, %6 : vector<16x128xf32>
    %c0_6 = arith.constant 0 : index
    %c0_7 = arith.constant 0 : index
    %8 = vector.load %arg9[%c0_6, %c0_7] : memref<16x128xf32, #tpu.memory_space<vmem>>, vector<16x128xf32>
    tpu.vector_store %arg9[%c0_6, %c0_7], %7 {strides = array<i32>} : memref<16x128xf32, #tpu.memory_space<vmem>>, vector<16x128xf32>,
    %c0_i32_8 = arith.constant 0 : i32
    %9 = arith.cmpi eq, %arg1, %c0_i32_8 : i32
    %10 = arith.extui %9 : i1 to i32
    %c0_i32_9 = arith.constant 0 : i32
    %11 = arith.cmpi ne, %10, %c0_i32_9 : i32
    scf.if %11 {
      %c0_10 = arith.constant 0 : index
      %c0_11 = arith.constant 0 : index
      %12 = vector.load %arg9[%c0_10, %c0_11] : memref<16x128xf32, #tpu.memory_space<vmem>>, vector<16x128xf32>
      %c0_12 = arith.constant 0 : index
      %c0_13 = arith.constant 0 : index
      %13 = vector.load %arg4[%c0_12, %c0_13] : memref<1x128xf32, #tpu.memory_space<vmem>>, vector<1x128xf32>
      %14 = vector.broadcast %13 : vector<1x128xf32> to vector<16x128xf32>
      %15 = arith.addf %12, %14 : vector<16x128xf32>
      %c0_14 = arith.constant 0 : index
      %c0_15 = arith.constant 0 : index
      %16 = vector.load %arg5[%c0_14, %c0_15] : memref<16x128xf32, #tpu.memory_space<vmem>>, vector<16x128xf32>
      %17 = arith.addf %15, %16 : vector<16x128xf32>
      %cst_16 = arith.constant dense<0.000000e+00> : vector<16xf32>
      %18 = vector.multi_reduction <add>, %17, %cst_16 [1] : vector<16x128xf32> to vector<16xf32>
      %19 = vector.shape_cast %18 : vector<16xf32> to vector<16x1xf32>
      %cst_17 = arith.constant 1.280000e+02 : f32
      %20 = vector.broadcast %cst_17 : f32 to vector<16x1xf32>
      %21 = arith.divf %19, %20 : vector<16x1xf32>
      %22 = vector.broadcast %21 : vector<16x1xf32> to vector<16x128xf32>
      %23 = arith.subf %17, %22 : vector<16x128xf32>
      %24 = arith.mulf %23, %23 : vector<16x128xf32>
      %cst_18 = arith.constant dense<0.000000e+00> : vector<16xf32>
      %25 = vector.multi_reduction <add>, %24, %cst_18 [1] : vector<16x128xf32> to vector<16xf32>
      %26 = vector.shape_cast %25 : vector<16xf32> to vector<16x1xf32>
      %cst_19 = arith.constant 1.280000e+02 : f32
      %27 = vector.broadcast %cst_19 : f32 to vector<16x1xf32>
      %28 = arith.divf %26, %27 : vector<16x1xf32>
      %29 = vector.broadcast %21 : vector<16x1xf32> to vector<16x128xf32>
      %30 = arith.subf %17, %29 : vector<16x128xf32>
      %cst_20 = arith.constant 9.99999997E-7 : f32
      %31 = vector.broadcast %cst_20 : f32 to vector<16x1xf32>
      %32 = arith.addf %28, %31 : vector<16x1xf32>
      %33 = math.rsqrt %32 : vector<16x1xf32>
      %34 = vector.broadcast %33 : vector<16x1xf32> to vector<16x128xf32>
      %35 = arith.mulf %30, %34 : vector<16x128xf32>
      %c0_21 = arith.constant 0 : index
      %c0_22 = arith.constant 0 : index
      %36 = vector.load %arg6[%c0_21, %c0_22] : memref<1x128xf32, #tpu.memory_space<vmem>>, vector<1x128xf32>
      %37 = vector.broadcast %36 : vector<1x128xf32> to vector<16x128xf32>
      %38 = arith.mulf %35, %37 : vector<16x128xf32>
      %c0_23 = arith.constant 0 : index
      %c0_24 = arith.constant 0 : index
      %39 = vector.load %arg7[%c0_23, %c0_24] : memref<1x128xf32, #tpu.memory_space<vmem>>, vector<1x128xf32>
      %40 = vector.broadcast %39 : vector<1x128xf32> to vector<16x128xf32>
      %41 = arith.addf %38, %40 : vector<16x128xf32>
      %42 = arith.truncf %41 : vector<16x128xf32> to vector<16x128xbf16>
      %c0_25 = arith.constant 0 : index
      %c0_26 = arith.constant 0 : index
      %43 = vector.load %arg8[%c0_25, %c0_26] : memref<16x128xbf16, #tpu.memory_space<vmem>>, vector<16x128xbf16>
      tpu.vector_store %arg8[%c0_25, %c0_26], %42 {strides = array<i32>} : memref<16x128xbf16, #tpu.memory_space<vmem>>, vector<16x128xbf16>,
    } else {
    }
    return
  }
  func.func @transform_0(%arg0: i32, %arg1: i32) -> (i32, i32) {
    %c0_i32 = arith.constant 0 : i32
    return %arg0, %arg1 : i32, i32
  }
  func.func @transform_1(%arg0: i32, %arg1: i32) -> (i32, i32) {
    %c0_i32 = arith.constant 0 : i32
    %c0_i32_0 = arith.constant 0 : i32
    return %arg1, %c0_i32 : i32, i32
  }
  func.func @transform_2(%arg0: i32, %arg1: i32) -> (i32, i32) {
    %c0_i32 = arith.constant 0 : i32
    %c0_i32_0 = arith.constant 0 : i32
    %c0_i32_1 = arith.constant 0 : i32
    return %c0_i32, %c0_i32_0 : i32, i32
  }
  func.func @transform_3(%arg0: i32, %arg1: i32) -> (i32, i32) {
    %c0_i32 = arith.constant 0 : i32
    %c0_i32_0 = arith.constant 0 : i32
    return %arg0, %c0_i32 : i32, i32
  }
  func.func @transform_4(%arg0: i32, %arg1: i32) -> (i32, i32) {
    %c0_i32 = arith.constant 0 : i32
    %c0_i32_0 = arith.constant 0 : i32
    %c0_i32_1 = arith.constant 0 : i32
    return %c0_i32, %c0_i32_0 : i32, i32
  }
  func.func @transform_5(%arg0: i32, %arg1: i32) -> (i32, i32) {
    %c0_i32 = arith.constant 0 : i32
    %c0_i32_0 = arith.constant 0 : i32
    %c0_i32_1 = arith.constant 0 : i32
    return %c0_i32, %c0_i32_0 : i32, i32
  }
  func.func @transform_6(%arg0: i32, %arg1: i32) -> (i32, i32) {
    %c0_i32 = arith.constant 0 : i32
    %c0_i32_0 = arith.constant 0 : i32
    return %arg0, %c0_i32 : i32, i32
  }
}

module attributes {stable_mosaic.version = 11 : i64} {
  func.func @_linear_kernel(%arg0: i32, %arg1: i32, %arg2: i32, %arg3: memref<16x128xbf16, #tpu.memory_space<vmem>>, %arg4: memref<128x256xbf16, #tpu.memory_space<vmem>>, %arg5: memref<1x256xf32, #tpu.memory_space<vmem>>, %arg6: memref<16x256xbf16, #tpu.memory_space<vmem>>, %arg7: memref<16x256xf32, #tpu.memory_space<vmem>>) attributes {dimension_semantics = [#tpu.dimension_semantics<parallel>, #tpu.dimension_semantics<parallel>, #tpu.dimension_semantics<arbitrary>], iteration_bounds = array<i64: 1, 1, 1>, scalar_prefetch = 0 : i64, scratch_operands = 1 : i64, tpu.core_type = #tpu.core_type<tc>, window_params = [{transform_indices = @transform_0, window_bounds = array<i64: 16, 128>}, {transform_indices = @transform_1, window_bounds = array<i64: 128, 256>}, {transform_indices = @transform_2, window_bounds = array<i64: 1, 256>}, {transform_indices = @transform_3, window_bounds = array<i64: 16, 256>}]} {
    %c0_i32 = arith.constant 0 : i32
    %0 = arith.cmpi eq, %arg2, %c0_i32 : i32
    %1 = arith.extui %0 : i1 to i32
    %c0_i32_0 = arith.constant 0 : i32
    %2 = arith.cmpi ne, %1, %c0_i32_0 : i32
    scf.if %2 {
      %cst_10 = arith.constant 0.000000e+00 : f32
      %12 = vector.broadcast %cst_10 : f32 to vector<16x256xf32>
      %c0_11 = arith.constant 0 : index
      %c0_12 = arith.constant 0 : index
      %13 = vector.load %arg7[%c0_11, %c0_12] : memref<16x256xf32, #tpu.memory_space<vmem>>, vector<16x256xf32>
      tpu.vector_store %arg7[%c0_11, %c0_12], %12 {strides = array<i32>} : memref<16x256xf32, #tpu.memory_space<vmem>>, vector<16x256xf32>,
    } else {
    }
    %c0 = arith.constant 0 : index
    %c0_1 = arith.constant 0 : index
    %3 = vector.load %arg3[%c0, %c0_1] : memref<16x128xbf16, #tpu.memory_space<vmem>>, vector<16x128xbf16>
    %c0_2 = arith.constant 0 : index
    %c0_3 = arith.constant 0 : index
    %4 = vector.load %arg4[%c0_2, %c0_3] : memref<128x256xbf16, #tpu.memory_space<vmem>>, vector<128x256xbf16>
    %c0_4 = arith.constant 0 : index
    %c0_5 = arith.constant 0 : index
    %5 = vector.load %arg7[%c0_4, %c0_5] : memref<16x256xf32, #tpu.memory_space<vmem>>, vector<16x256xf32>
    %cst = arith.constant dense<0.000000e+00> : vector<16x256xf32>
    %6 = tpu.matmul %3, %4, %cst {dimension_numbers = #tpu.dot_dimension_numbers<[1], [0], [0], [1], [0, 0, 1, 1], [], []>} : vector<16x128xbf16>, vector<128x256xbf16>, vector<16x256xf32> -> vector<16x256xf32>
    %7 = arith.addf %5, %6 : vector<16x256xf32>
    %c0_6 = arith.constant 0 : index
    %c0_7 = arith.constant 0 : index
    %8 = vector.load %arg7[%c0_6, %c0_7] : memref<16x256xf32, #tpu.memory_space<vmem>>, vector<16x256xf32>
    tpu.vector_store %arg7[%c0_6, %c0_7], %7 {strides = array<i32>} : memref<16x256xf32, #tpu.memory_space<vmem>>, vector<16x256xf32>,
    %c0_i32_8 = arith.constant 0 : i32
    %9 = arith.cmpi eq, %arg2, %c0_i32_8 : i32
    %10 = arith.extui %9 : i1 to i32
    %c0_i32_9 = arith.constant 0 : i32
    %11 = arith.cmpi ne, %10, %c0_i32_9 : i32
    scf.if %11 {
      %c0_10 = arith.constant 0 : index
      %c0_11 = arith.constant 0 : index
      %12 = vector.load %arg7[%c0_10, %c0_11] : memref<16x256xf32, #tpu.memory_space<vmem>>, vector<16x256xf32>
      %c0_12 = arith.constant 0 : index
      %c0_13 = arith.constant 0 : index
      %13 = vector.load %arg5[%c0_12, %c0_13] : memref<1x256xf32, #tpu.memory_space<vmem>>, vector<1x256xf32>
      %14 = vector.broadcast %13 : vector<1x256xf32> to vector<16x256xf32>
      %15 = arith.addf %12, %14 : vector<16x256xf32>
      %cst_14 = arith.constant 0.000000e+00 : f32
      %16 = vector.broadcast %cst_14 : f32 to vector<16x256xf32>
      %17 = arith.maximumf %15, %16 : vector<16x256xf32>
      %18 = arith.truncf %17 : vector<16x256xf32> to vector<16x256xbf16>
      %c0_15 = arith.constant 0 : index
      %c0_16 = arith.constant 0 : index
      %19 = vector.load %arg6[%c0_15, %c0_16] : memref<16x256xbf16, #tpu.memory_space<vmem>>, vector<16x256xbf16>
      tpu.vector_store %arg6[%c0_15, %c0_16], %18 {strides = array<i32>} : memref<16x256xbf16, #tpu.memory_space<vmem>>, vector<16x256xbf16>,
    } else {
    }
    return
  }
  func.func @transform_0(%arg0: i32, %arg1: i32, %arg2: i32) -> (i32, i32) {
    %c0_i32 = arith.constant 0 : i32
    return %arg0, %arg2 : i32, i32
  }
  func.func @transform_1(%arg0: i32, %arg1: i32, %arg2: i32) -> (i32, i32) {
    %c0_i32 = arith.constant 0 : i32
    return %arg2, %arg1 : i32, i32
  }
  func.func @transform_2(%arg0: i32, %arg1: i32, %arg2: i32) -> (i32, i32) {
    %c0_i32 = arith.constant 0 : i32
    %c0_i32_0 = arith.constant 0 : i32
    return %c0_i32, %arg1 : i32, i32
  }
  func.func @transform_3(%arg0: i32, %arg1: i32, %arg2: i32) -> (i32, i32) {
    %c0_i32 = arith.constant 0 : i32
    return %arg0, %arg1 : i32, i32
  }
}

module attributes {stable_mosaic.version = 11 : i64} {
  func.func @_flash_mha_kernel(%arg0: i32, %arg1: i32, %arg2: i32, %arg3: memref<1x8x128xbf16, #tpu.memory_space<vmem>>, %arg4: memref<1x8x128xbf16, #tpu.memory_space<vmem>>, %arg5: memref<1x8x128xbf16, #tpu.memory_space<vmem>>, %arg6: memref<1x1x8xi32, #tpu.memory_space<vmem>>, %arg7: memref<1x8x128xbf16, #tpu.memory_space<vmem>>, %arg8: memref<4x8x1xf32, #tpu.memory_space<vmem>>, %arg9: memref<4x8x1xf32, #tpu.memory_space<vmem>>, %arg10: memref<4x8x32xf32, #tpu.memory_space<vmem>>) attributes {dimension_semantics = [#tpu.dimension_semantics<parallel>, #tpu.dimension_semantics<parallel>, #tpu.dimension_semantics<arbitrary>], iteration_bounds = array<i64: 2, 1, 1>, scalar_prefetch = 0 : i64, scratch_operands = 3 : i64, tpu.core_type = #tpu.core_type<tc>, window_params = [{transform_indices = @transform_0, window_bounds = array<i64: 1, 8, 128>}, {transform_indices = @transform_1, window_bounds = array<i64: 1, 8, 128>}, {transform_indices = @transform_2, window_bounds = array<i64: 1, 8, 128>}, {transform_indices = @transform_3, window_bounds = array<i64: 1, 1, 8>}, {transform_indices = @transform_4, window_bounds = array<i64: 1, 8, 128>}]} {
    %c0_i32 = arith.constant 0 : i32
    %0 = arith.cmpi eq, %arg2, %c0_i32 : i32
    %1 = arith.extui %0 : i1 to i32
    %c0_i32_0 = arith.constant 0 : i32
    %2 = arith.cmpi ne, %1, %c0_i32_0 : i32
    scf.if %2 {
      %cst_104 = arith.constant 0xFF800000 : f32
      %179 = vector.broadcast %cst_104 : f32 to vector<4x8x1xf32>
      %c0_105 = arith.constant 0 : index
      %c0_106 = arith.constant 0 : index
      %c0_107 = arith.constant 0 : index
      %180 = vector.load %arg8[%c0_105, %c0_106, %c0_107] : memref<4x8x1xf32, #tpu.memory_space<vmem>>, vector<4x8x1xf32>
      tpu.vector_store %arg8[%c0_105, %c0_106, %c0_107], %179 {strides = array<i32>} : memref<4x8x1xf32, #tpu.memory_space<vmem>>, vector<4x8x1xf32>,
      %cst_108 = arith.constant 0.000000e+00 : f32
      %181 = vector.broadcast %cst_108 : f32 to vector<4x8x1xf32>
      %c0_109 = arith.constant 0 : index
      %c0_110 = arith.constant 0 : index
      %c0_111 = arith.constant 0 : index
      %182 = vector.load %arg9[%c0_109, %c0_110, %c0_111] : memref<4x8x1xf32, #tpu.memory_space<vmem>>, vector<4x8x1xf32>
      tpu.vector_store %arg9[%c0_109, %c0_110, %c0_111], %181 {strides = array<i32>} : memref<4x8x1xf32, #tpu.memory_space<vmem>>, vector<4x8x1xf32>,
      %cst_112 = arith.constant 0.000000e+00 : f32
      %183 = vector.broadcast %cst_112 : f32 to vector<4x8x32xf32>
      %c0_113 = arith.constant 0 : index
      %c0_114 = arith.constant 0 : index
      %c0_115 = arith.constant 0 : index
      %184 = vector.load %arg10[%c0_113, %c0_114, %c0_115] : memref<4x8x32xf32, #tpu.memory_space<vmem>>, vector<4x8x32xf32>
      tpu.vector_store %arg10[%c0_113, %c0_114, %c0_115], %183 {strides = array<i32>} : memref<4x8x32xf32, #tpu.memory_space<vmem>>, vector<4x8x32xf32>,
    } else {
    }
    %c0 = arith.constant 0 : index
    %c0_1 = arith.constant 0 : index
    %c0_2 = arith.constant 0 : index
    %3 = vector.load %arg3[%c0, %c0_1, %c0_2] : memref<1x8x128xbf16, #tpu.memory_space<vmem>>, vector<1x8x128xbf16>
    %4 = vector.shape_cast %3 : vector<1x8x128xbf16> to vector<8x128xbf16>
    %c0_3 = arith.constant 0 : index
    %c0_4 = arith.constant 0 : index
    %c0_5 = arith.constant 0 : index
    %5 = vector.load %arg4[%c0_3, %c0_4, %c0_5] : memref<1x8x128xbf16, #tpu.memory_space<vmem>>, vector<1x8x128xbf16>
    %6 = vector.shape_cast %5 : vector<1x8x128xbf16> to vector<8x128xbf16>
    %c0_6 = arith.constant 0 : index
    %c0_7 = arith.constant 0 : index
    %c0_8 = arith.constant 0 : index
    %7 = vector.load %arg5[%c0_6, %c0_7, %c0_8] : memref<1x8x128xbf16, #tpu.memory_space<vmem>>, vector<1x8x128xbf16>
    %8 = vector.shape_cast %7 : vector<1x8x128xbf16> to vector<8x128xbf16>
    %c8_i32 = arith.constant 8 : i32
    %9 = arith.muli %arg1, %c8_i32 : i32
    %10 = tpu.iota {dimensions = array<i32: 0>} : vector<8x8xi32>
    %11 = vector.broadcast %9 : i32 to vector<8x8xi32>
    %12 = arith.addi %11, %10 : vector<8x8xi32>
    %c8_i32_9 = arith.constant 8 : i32
    %13 = arith.muli %arg2, %c8_i32_9 : i32
    %14 = tpu.iota {dimensions = array<i32: 1>} : vector<8x8xi32>
    %15 = vector.broadcast %13 : i32 to vector<8x8xi32>
    %16 = arith.addi %15, %14 : vector<8x8xi32>
    %17 = arith.cmpi sle, %16, %12 : vector<8x8xi32>
    %c0_10 = arith.constant 0 : index
    %c0_11 = arith.constant 0 : index
    %c0_12 = arith.constant 0 : index
    %18 = vector.load %arg6[%c0_10, %c0_11, %c0_12] : memref<1x1x8xi32, #tpu.memory_space<vmem>>, vector<1x1x8xi32>
    %19 = vector.shape_cast %18 : vector<1x1x8xi32> to vector<1x8xi32>
    %c0_i32_13 = arith.constant 0 : i32
    %20 = vector.broadcast %c0_i32_13 : i32 to vector<1x8xi32>
    %21 = arith.cmpi sgt, %19, %20 : vector<1x8xi32>
    %22 = vector.broadcast %21 : vector<1x8xi1> to vector<8x8xi1>
    %23 = arith.andi %17, %22 : vector<8x8xi1>
    %24 = vector.extract_strided_slice %4 {offsets = [0, 0], sizes = [8, 32], strides = [1, 1]} : vector<8x128xbf16> to vector<8x32xbf16>
    %25 = vector.extract_strided_slice %6 {offsets = [0, 0], sizes = [8, 32], strides = [1, 1]} : vector<8x128xbf16> to vector<8x32xbf16>
    %26 = vector.extract_strided_slice %8 {offsets = [0, 0], sizes = [8, 32], strides = [1, 1]} : vector<8x128xbf16> to vector<8x32xbf16>
    %cst = arith.constant dense<0.000000e+00> : vector<8x8xf32>
    %27 = tpu.matmul %24, %25, %cst {dimension_numbers = #tpu.dot_dimension_numbers<[1], [1], [0], [0], [0, 0, 1, 0], [], []>} : vector<8x32xbf16>, vector<8x32xbf16>, vector<8x8xf32> -> vector<8x8xf32>
    %cst_14 = arith.constant -1.000000e+09 : f32
    %28 = vector.broadcast %cst_14 : f32 to vector<8x8xf32>
    %29 = arith.select %23, %27, %28 : vector<8x8xi1>, vector<8x8xf32>
    %c0_15 = arith.constant 0 : index
    %c0_16 = arith.constant 0 : index
    %c0_17 = arith.constant 0 : index
    %30 = vector.load %arg8[%c0_15, %c0_16, %c0_17] : memref<4x8x1xf32, #tpu.memory_space<vmem>>, vector<1x8x1xf32>
    %31 = vector.shape_cast %30 : vector<1x8x1xf32> to vector<8x1xf32>
    %cst_18 = arith.constant dense<0xFF800000> : vector<8xf32>
    %32 = vector.multi_reduction <maximumf>, %29, %cst_18 [1] : vector<8x8xf32> to vector<8xf32>
    %33 = vector.shape_cast %32 : vector<8xf32> to vector<8x1xf32>
    %34 = arith.maximumf %31, %33 : vector<8x1xf32>
    %35 = arith.subf %31, %34 : vector<8x1xf32>
    %36 = math.exp %35 : vector<8x1xf32>
    %37 = vector.broadcast %34 : vector<8x1xf32> to vector<8x8xf32>
    %38 = arith.subf %29, %37 : vector<8x8xf32>
    %39 = math.exp %38 : vector<8x8xf32>
    %c0_19 = arith.constant 0 : index
    %c0_20 = arith.constant 0 : index
    %c0_21 = arith.constant 0 : index
    %40 = vector.load %arg9[%c0_19, %c0_20, %c0_21] : memref<4x8x1xf32, #tpu.memory_space<vmem>>, vector<1x8x1xf32>
    %41 = vector.shape_cast %40 : vector<1x8x1xf32> to vector<8x1xf32>
    %42 = arith.mulf %36, %41 : vector<8x1xf32>
    %cst_22 = arith.constant dense<0.000000e+00> : vector<8xf32>
    %43 = vector.multi_reduction <add>, %39, %cst_22 [1] : vector<8x8xf32> to vector<8xf32>
    %44 = vector.shape_cast %43 : vector<8xf32> to vector<8x1xf32>
    %45 = arith.addf %42, %44 : vector<8x1xf32>
    %c0_23 = arith.constant 0 : index
    %c0_24 = arith.constant 0 : index
    %c0_25 = arith.constant 0 : index
    %46 = vector.load %arg9[%c0_23, %c0_24, %c0_25] : memref<4x8x1xf32, #tpu.memory_space<vmem>>, vector<1x8x1xf32>
    %47 = vector.shape_cast %46 : vector<1x8x1xf32> to vector<8x1xf32>
    %48 = vector.shape_cast %45 : vector<8x1xf32> to vector<1x8x1xf32>
    tpu.vector_store %arg9[%c0_23, %c0_24, %c0_25], %48 {strides = array<i32>} : memref<4x8x1xf32, #tpu.memory_space<vmem>>, vector<1x8x1xf32>,
    %49 = arith.truncf %39 : vector<8x8xf32> to vector<8x8xbf16>
    %cst_26 = arith.constant dense<0.000000e+00> : vector<8x32xf32>
    %50 = tpu.matmul %49, %26, %cst_26 {dimension_numbers = #tpu.dot_dimension_numbers<[1], [0], [0], [1], [0, 0, 1, 1], [], []>} : vector<8x8xbf16>, vector<8x32xbf16>, vector<8x32xf32> -> vector<8x32xf32>
    %c0_27 = arith.constant 0 : index
    %c0_28 = arith.constant 0 : index
    %c0_29 = arith.constant 0 : index
    %51 = vector.load %arg10[%c0_27, %c0_28, %c0_29] : memref<4x8x32xf32, #tpu.memory_space<vmem>>, vector<1x8x32xf32>
    %52 = vector.shape_cast %51 : vector<1x8x32xf32> to vector<8x32xf32>
    %53 = vector.broadcast %36 : vector<8x1xf32> to vector<8x32xf32>
    %54 = arith.mulf %53, %52 : vector<8x32xf32>
    %55 = arith.addf %54, %50 : vector<8x32xf32>
    %c0_30 = arith.constant 0 : index
    %c0_31 = arith.constant 0 : index
    %c0_32 = arith.constant 0 : index
    %56 = vector.load %arg10[%c0_30, %c0_31, %c0_32] : memref<4x8x32xf32, #tpu.memory_space<vmem>>, vector<1x8x32xf32>
    %57 = vector.shape_cast %56 : vector<1x8x32xf32> to vector<8x32xf32>
    %58 = vector.shape_cast %55 : vector<8x32xf32> to vector<1x8x32xf32>
    tpu.vector_store %arg10[%c0_30, %c0_31, %c0_32], %58 {strides = array<i32>} : memref<4x8x32xf32, #tpu.memory_space<vmem>>, vector<1x8x32xf32>,
    %c0_33 = arith.constant 0 : index
    %c0_34 = arith.constant 0 : index
    %c0_35 = arith.constant 0 : index
    %59 = vector.load %arg8[%c0_33, %c0_34, %c0_35] : memref<4x8x1xf32, #tpu.memory_space<vmem>>, vector<1x8x1xf32>
    %60 = vector.shape_cast %59 : vector<1x8x1xf32> to vector<8x1xf32>
    %61 = vector.shape_cast %34 : vector<8x1xf32> to vector<1x8x1xf32>
    tpu.vector_store %arg8[%c0_33, %c0_34, %c0_35], %61 {strides = array<i32>} : memref<4x8x1xf32, #tpu.memory_space<vmem>>, vector<1x8x1xf32>,
    %62 = vector.extract_strided_slice %4 {offsets = [0, 32], sizes = [8, 32], strides = [1, 1]} : vector<8x128xbf16> to vector<8x32xbf16>
    %63 = vector.extract_strided_slice %6 {offsets = [0, 32], sizes = [8, 32], strides = [1, 1]} : vector<8x128xbf16> to vector<8x32xbf16>
    %64 = vector.extract_strided_slice %8 {offsets = [0, 32], sizes = [8, 32], strides = [1, 1]} : vector<8x128xbf16> to vector<8x32xbf16>
    %cst_36 = arith.constant dense<0.000000e+00> : vector<8x8xf32>
    %65 = tpu.matmul %62, %63, %cst_36 {dimension_numbers = #tpu.dot_dimension_numbers<[1], [1], [0], [0], [0, 0, 1, 0], [], []>} : vector<8x32xbf16>, vector<8x32xbf16>, vector<8x8xf32> -> vector<8x8xf32>
    %cst_37 = arith.constant -1.000000e+09 : f32
    %66 = vector.broadcast %cst_37 : f32 to vector<8x8xf32>
    %67 = arith.select %23, %65, %66 : vector<8x8xi1>, vector<8x8xf32>
    %c1 = arith.constant 1 : index
    %c0_38 = arith.constant 0 : index
    %c0_39 = arith.constant 0 : index
    %68 = vector.load %arg8[%c1, %c0_38, %c0_39] : memref<4x8x1xf32, #tpu.memory_space<vmem>>, vector<1x8x1xf32>
    %69 = vector.shape_cast %68 : vector<1x8x1xf32> to vector<8x1xf32>
    %cst_40 = arith.constant dense<0xFF800000> : vector<8xf32>
    %70 = vector.multi_reduction <maximumf>, %67, %cst_40 [1] : vector<8x8xf32> to vector<8xf32>
    %71 = vector.shape_cast %70 : vector<8xf32> to vector<8x1xf32>
    %72 = arith.maximumf %69, %71 : vector<8x1xf32>
    %73 = arith.subf %69, %72 : vector<8x1xf32>
    %74 = math.exp %73 : vector<8x1xf32>
    %75 = vector.broadcast %72 : vector<8x1xf32> to vector<8x8xf32>
    %76 = arith.subf %67, %75 : vector<8x8xf32>
    %77 = math.exp %76 : vector<8x8xf32>
    %c1_41 = arith.constant 1 : index
    %c0_42 = arith.constant 0 : index
    %c0_43 = arith.constant 0 : index
    %78 = vector.load %arg9[%c1_41, %c0_42, %c0_43] : memref<4x8x1xf32, #tpu.memory_space<vmem>>, vector<1x8x1xf32>
    %79 = vector.shape_cast %78 : vector<1x8x1xf32> to vector<8x1xf32>
    %80 = arith.mulf %74, %79 : vector<8x1xf32>
    %cst_44 = arith.constant dense<0.000000e+00> : vector<8xf32>
    %81 = vector.multi_reduction <add>, %77, %cst_44 [1] : vector<8x8xf32> to vector<8xf32>
    %82 = vector.shape_cast %81 : vector<8xf32> to vector<8x1xf32>
    %83 = arith.addf %80, %82 : vector<8x1xf32>
    %c1_45 = arith.constant 1 : index
    %c0_46 = arith.constant 0 : index
    %c0_47 = arith.constant 0 : index
    %84 = vector.load %arg9[%c1_45, %c0_46, %c0_47] : memref<4x8x1xf32, #tpu.memory_space<vmem>>, vector<1x8x1xf32>
    %85 = vector.shape_cast %84 : vector<1x8x1xf32> to vector<8x1xf32>
    %86 = vector.shape_cast %83 : vector<8x1xf32> to vector<1x8x1xf32>
    tpu.vector_store %arg9[%c1_45, %c0_46, %c0_47], %86 {strides = array<i32>} : memref<4x8x1xf32, #tpu.memory_space<vmem>>, vector<1x8x1xf32>,
    %87 = arith.truncf %77 : vector<8x8xf32> to vector<8x8xbf16>
    %cst_48 = arith.constant dense<0.000000e+00> : vector<8x32xf32>
    %88 = tpu.matmul %87, %64, %cst_48 {dimension_numbers = #tpu.dot_dimension_numbers<[1], [0], [0], [1], [0, 0, 1, 1], [], []>} : vector<8x8xbf16>, vector<8x32xbf16>, vector<8x32xf32> -> vector<8x32xf32>
    %c1_49 = arith.constant 1 : index
    %c0_50 = arith.constant 0 : index
    %c0_51 = arith.constant 0 : index
    %89 = vector.load %arg10[%c1_49, %c0_50, %c0_51] : memref<4x8x32xf32, #tpu.memory_space<vmem>>, vector<1x8x32xf32>
    %90 = vector.shape_cast %89 : vector<1x8x32xf32> to vector<8x32xf32>
    %91 = vector.broadcast %74 : vector<8x1xf32> to vector<8x32xf32>
    %92 = arith.mulf %91, %90 : vector<8x32xf32>
    %93 = arith.addf %92, %88 : vector<8x32xf32>
    %c1_52 = arith.constant 1 : index
    %c0_53 = arith.constant 0 : index
    %c0_54 = arith.constant 0 : index
    %94 = vector.load %arg10[%c1_52, %c0_53, %c0_54] : memref<4x8x32xf32, #tpu.memory_space<vmem>>, vector<1x8x32xf32>
    %95 = vector.shape_cast %94 : vector<1x8x32xf32> to vector<8x32xf32>
    %96 = vector.shape_cast %93 : vector<8x32xf32> to vector<1x8x32xf32>
    tpu.vector_store %arg10[%c1_52, %c0_53, %c0_54], %96 {strides = array<i32>} : memref<4x8x32xf32, #tpu.memory_space<vmem>>, vector<1x8x32xf32>,
    %c1_55 = arith.constant 1 : index
    %c0_56 = arith.constant 0 : index
    %c0_57 = arith.constant 0 : index
    %97 = vector.load %arg8[%c1_55, %c0_56, %c0_57] : memref<4x8x1xf32, #tpu.memory_space<vmem>>, vector<1x8x1xf32>
    %98 = vector.shape_cast %97 : vector<1x8x1xf32> to vector<8x1xf32>
    %99 = vector.shape_cast %72 : vector<8x1xf32> to vector<1x8x1xf32>
    tpu.vector_store %arg8[%c1_55, %c0_56, %c0_57], %99 {strides = array<i32>} : memref<4x8x1xf32, #tpu.memory_space<vmem>>, vector<1x8x1xf32>,
    %100 = vector.extract_strided_slice %4 {offsets = [0, 64], sizes = [8, 32], strides = [1, 1]} : vector<8x128xbf16> to vector<8x32xbf16>
    %101 = vector.extract_strided_slice %6 {offsets = [0, 64], sizes = [8, 32], strides = [1, 1]} : vector<8x128xbf16> to vector<8x32xbf16>
    %102 = vector.extract_strided_slice %8 {offsets = [0, 64], sizes = [8, 32], strides = [1, 1]} : vector<8x128xbf16> to vector<8x32xbf16>
    %cst_58 = arith.constant dense<0.000000e+00> : vector<8x8xf32>
    %103 = tpu.matmul %100, %101, %cst_58 {dimension_numbers = #tpu.dot_dimension_numbers<[1], [1], [0], [0], [0, 0, 1, 0], [], []>} : vector<8x32xbf16>, vector<8x32xbf16>, vector<8x8xf32> -> vector<8x8xf32>
    %cst_59 = arith.constant -1.000000e+09 : f32
    %104 = vector.broadcast %cst_59 : f32 to vector<8x8xf32>
    %105 = arith.select %23, %103, %104 : vector<8x8xi1>, vector<8x8xf32>
    %c2 = arith.constant 2 : index
    %c0_60 = arith.constant 0 : index
    %c0_61 = arith.constant 0 : index
    %106 = vector.load %arg8[%c2, %c0_60, %c0_61] : memref<4x8x1xf32, #tpu.memory_space<vmem>>, vector<1x8x1xf32>
    %107 = vector.shape_cast %106 : vector<1x8x1xf32> to vector<8x1xf32>
    %cst_62 = arith.constant dense<0xFF800000> : vector<8xf32>
    %108 = vector.multi_reduction <maximumf>, %105, %cst_62 [1] : vector<8x8xf32> to vector<8xf32>
    %109 = vector.shape_cast %108 : vector<8xf32> to vector<8x1xf32>
    %110 = arith.maximumf %107, %109 : vector<8x1xf32>
    %111 = arith.subf %107, %110 : vector<8x1xf32>
    %112 = math.exp %111 : vector<8x1xf32>
    %113 = vector.broadcast %110 : vector<8x1xf32> to vector<8x8xf32>
    %114 = arith.subf %105, %113 : vector<8x8xf32>
    %115 = math.exp %114 : vector<8x8xf32>
    %c2_63 = arith.constant 2 : index
    %c0_64 = arith.constant 0 : index
    %c0_65 = arith.constant 0 : index
    %116 = vector.load %arg9[%c2_63, %c0_64, %c0_65] : memref<4x8x1xf32, #tpu.memory_space<vmem>>, vector<1x8x1xf32>
    %117 = vector.shape_cast %116 : vector<1x8x1xf32> to vector<8x1xf32>
    %118 = arith.mulf %112, %117 : vector<8x1xf32>
    %cst_66 = arith.constant dense<0.000000e+00> : vector<8xf32>
    %119 = vector.multi_reduction <add>, %115, %cst_66 [1] : vector<8x8xf32> to vector<8xf32>
    %120 = vector.shape_cast %119 : vector<8xf32> to vector<8x1xf32>
    %121 = arith.addf %118, %120 : vector<8x1xf32>
    %c2_67 = arith.constant 2 : index
    %c0_68 = arith.constant 0 : index
    %c0_69 = arith.constant 0 : index
    %122 = vector.load %arg9[%c2_67, %c0_68, %c0_69] : memref<4x8x1xf32, #tpu.memory_space<vmem>>, vector<1x8x1xf32>
    %123 = vector.shape_cast %122 : vector<1x8x1xf32> to vector<8x1xf32>
    %124 = vector.shape_cast %121 : vector<8x1xf32> to vector<1x8x1xf32>
    tpu.vector_store %arg9[%c2_67, %c0_68, %c0_69], %124 {strides = array<i32>} : memref<4x8x1xf32, #tpu.memory_space<vmem>>, vector<1x8x1xf32>,
    %125 = arith.truncf %115 : vector<8x8xf32> to vector<8x8xbf16>
    %cst_70 = arith.constant dense<0.000000e+00> : vector<8x32xf32>
    %126 = tpu.matmul %125, %102, %cst_70 {dimension_numbers = #tpu.dot_dimension_numbers<[1], [0], [0], [1], [0, 0, 1, 1], [], []>} : vector<8x8xbf16>, vector<8x32xbf16>, vector<8x32xf32> -> vector<8x32xf32>
    %c2_71 = arith.constant 2 : index
    %c0_72 = arith.constant 0 : index
    %c0_73 = arith.constant 0 : index
    %127 = vector.load %arg10[%c2_71, %c0_72, %c0_73] : memref<4x8x32xf32, #tpu.memory_space<vmem>>, vector<1x8x32xf32>
    %128 = vector.shape_cast %127 : vector<1x8x32xf32> to vector<8x32xf32>
    %129 = vector.broadcast %112 : vector<8x1xf32> to vector<8x32xf32>
    %130 = arith.mulf %129, %128 : vector<8x32xf32>
    %131 = arith.addf %130, %126 : vector<8x32xf32>
    %c2_74 = arith.constant 2 : index
    %c0_75 = arith.constant 0 : index
    %c0_76 = arith.constant 0 : index
    %132 = vector.load %arg10[%c2_74, %c0_75, %c0_76] : memref<4x8x32xf32, #tpu.memory_space<vmem>>, vector<1x8x32xf32>
    %133 = vector.shape_cast %132 : vector<1x8x32xf32> to vector<8x32xf32>
    %134 = vector.shape_cast %131 : vector<8x32xf32> to vector<1x8x32xf32>
    tpu.vector_store %arg10[%c2_74, %c0_75, %c0_76], %134 {strides = array<i32>} : memref<4x8x32xf32, #tpu.memory_space<vmem>>, vector<1x8x32xf32>,
    %c2_77 = arith.constant 2 : index
    %c0_78 = arith.constant 0 : index
    %c0_79 = arith.constant 0 : index
    %135 = vector.load %arg8[%c2_77, %c0_78, %c0_79] : memref<4x8x1xf32, #tpu.memory_space<vmem>>, vector<1x8x1xf32>
    %136 = vector.shape_cast %135 : vector<1x8x1xf32> to vector<8x1xf32>
    %137 = vector.shape_cast %110 : vector<8x1xf32> to vector<1x8x1xf32>
    tpu.vector_store %arg8[%c2_77, %c0_78, %c0_79], %137 {strides = array<i32>} : memref<4x8x1xf32, #tpu.memory_space<vmem>>, vector<1x8x1xf32>,
    %138 = vector.extract_strided_slice %4 {offsets = [0, 96], sizes = [8, 32], strides = [1, 1]} : vector<8x128xbf16> to vector<8x32xbf16>
    %139 = vector.extract_strided_slice %6 {offsets = [0, 96], sizes = [8, 32], strides = [1, 1]} : vector<8x128xbf16> to vector<8x32xbf16>
    %140 = vector.extract_strided_slice %8 {offsets = [0, 96], sizes = [8, 32], strides = [1, 1]} : vector<8x128xbf16> to vector<8x32xbf16>
    %cst_80 = arith.constant dense<0.000000e+00> : vector<8x8xf32>
    %141 = tpu.matmul %138, %139, %cst_80 {dimension_numbers = #tpu.dot_dimension_numbers<[1], [1], [0], [0], [0, 0, 1, 0], [], []>} : vector<8x32xbf16>, vector<8x32xbf16>, vector<8x8xf32> -> vector<8x8xf32>
    %cst_81 = arith.constant -1.000000e+09 : f32
    %142 = vector.broadcast %cst_81 : f32 to vector<8x8xf32>
    %143 = arith.select %23, %141, %142 : vector<8x8xi1>, vector<8x8xf32>
    %c3 = arith.constant 3 : index
    %c0_82 = arith.constant 0 : index
    %c0_83 = arith.constant 0 : index
    %144 = vector.load %arg8[%c3, %c0_82, %c0_83] : memref<4x8x1xf32, #tpu.memory_space<vmem>>, vector<1x8x1xf32>
    %145 = vector.shape_cast %144 : vector<1x8x1xf32> to vector<8x1xf32>
    %cst_84 = arith.constant dense<0xFF800000> : vector<8xf32>
    %146 = vector.multi_reduction <maximumf>, %143, %cst_84 [1] : vector<8x8xf32> to vector<8xf32>
    %147 = vector.shape_cast %146 : vector<8xf32> to vector<8x1xf32>
    %148 = arith.maximumf %145, %147 : vector<8x1xf32>
    %149 = arith.subf %145, %148 : vector<8x1xf32>
    %150 = math.exp %149 : vector<8x1xf32>
    %151 = vector.broadcast %148 : vector<8x1xf32> to vector<8x8xf32>
    %152 = arith.subf %143, %151 : vector<8x8xf32>
    %153 = math.exp %152 : vector<8x8xf32>
    %c3_85 = arith.constant 3 : index
    %c0_86 = arith.constant 0 : index
    %c0_87 = arith.constant 0 : index
    %154 = vector.load %arg9[%c3_85, %c0_86, %c0_87] : memref<4x8x1xf32, #tpu.memory_space<vmem>>, vector<1x8x1xf32>
    %155 = vector.shape_cast %154 : vector<1x8x1xf32> to vector<8x1xf32>
    %156 = arith.mulf %150, %155 : vector<8x1xf32>
    %cst_88 = arith.constant dense<0.000000e+00> : vector<8xf32>
    %157 = vector.multi_reduction <add>, %153, %cst_88 [1] : vector<8x8xf32> to vector<8xf32>
    %158 = vector.shape_cast %157 : vector<8xf32> to vector<8x1xf32>
    %159 = arith.addf %156, %158 : vector<8x1xf32>
    %c3_89 = arith.constant 3 : index
    %c0_90 = arith.constant 0 : index
    %c0_91 = arith.constant 0 : index
    %160 = vector.load %arg9[%c3_89, %c0_90, %c0_91] : memref<4x8x1xf32, #tpu.memory_space<vmem>>, vector<1x8x1xf32>
    %161 = vector.shape_cast %160 : vector<1x8x1xf32> to vector<8x1xf32>
    %162 = vector.shape_cast %159 : vector<8x1xf32> to vector<1x8x1xf32>
    tpu.vector_store %arg9[%c3_89, %c0_90, %c0_91], %162 {strides = array<i32>} : memref<4x8x1xf32, #tpu.memory_space<vmem>>, vector<1x8x1xf32>,
    %163 = arith.truncf %153 : vector<8x8xf32> to vector<8x8xbf16>
    %cst_92 = arith.constant dense<0.000000e+00> : vector<8x32xf32>
    %164 = tpu.matmul %163, %140, %cst_92 {dimension_numbers = #tpu.dot_dimension_numbers<[1], [0], [0], [1], [0, 0, 1, 1], [], []>} : vector<8x8xbf16>, vector<8x32xbf16>, vector<8x32xf32> -> vector<8x32xf32>
    %c3_93 = arith.constant 3 : index
    %c0_94 = arith.constant 0 : index
    %c0_95 = arith.constant 0 : index
    %165 = vector.load %arg10[%c3_93, %c0_94, %c0_95] : memref<4x8x32xf32, #tpu.memory_space<vmem>>, vector<1x8x32xf32>
    %166 = vector.shape_cast %165 : vector<1x8x32xf32> to vector<8x32xf32>
    %167 = vector.broadcast %150 : vector<8x1xf32> to vector<8x32xf32>
    %168 = arith.mulf %167, %166 : vector<8x32xf32>
    %169 = arith.addf %168, %164 : vector<8x32xf32>
    %c3_96 = arith.constant 3 : index
    %c0_97 = arith.constant 0 : index
    %c0_98 = arith.constant 0 : index
    %170 = vector.load %arg10[%c3_96, %c0_97, %c0_98] : memref<4x8x32xf32, #tpu.memory_space<vmem>>, vector<1x8x32xf32>
    %171 = vector.shape_cast %170 : vector<1x8x32xf32> to vector<8x32xf32>
    %172 = vector.shape_cast %169 : vector<8x32xf32> to vector<1x8x32xf32>
    tpu.vector_store %arg10[%c3_96, %c0_97, %c0_98], %172 {strides = array<i32>} : memref<4x8x32xf32, #tpu.memory_space<vmem>>, vector<1x8x32xf32>,
    %c3_99 = arith.constant 3 : index
    %c0_100 = arith.constant 0 : index
    %c0_101 = arith.constant 0 : index
    %173 = vector.load %arg8[%c3_99, %c0_100, %c0_101] : memref<4x8x1xf32, #tpu.memory_space<vmem>>, vector<1x8x1xf32>
    %174 = vector.shape_cast %173 : vector<1x8x1xf32> to vector<8x1xf32>
    %175 = vector.shape_cast %148 : vector<8x1xf32> to vector<1x8x1xf32>
    tpu.vector_store %arg8[%c3_99, %c0_100, %c0_101], %175 {strides = array<i32>} : memref<4x8x1xf32, #tpu.memory_space<vmem>>, vector<1x8x1xf32>,
    %c0_i32_102 = arith.constant 0 : i32
    %176 = arith.cmpi eq, %arg2, %c0_i32_102 : i32
    %177 = arith.extui %176 : i1 to i32
    %c0_i32_103 = arith.constant 0 : i32
    %178 = arith.cmpi ne, %177, %c0_i32_103 : i32
    scf.if %178 {
      %c0_104 = arith.constant 0 : index
      %c0_105 = arith.constant 0 : index
      %c0_106 = arith.constant 0 : index
      %179 = vector.load %arg9[%c0_104, %c0_105, %c0_106] : memref<4x8x1xf32, #tpu.memory_space<vmem>>, vector<1x8x1xf32>
      %180 = vector.shape_cast %179 : vector<1x8x1xf32> to vector<8x1xf32>
      %181 = tpu.reciprocal %180 {approx = true} : vector<8x1xf32> -> vector<8x1xf32>
      %c0_107 = arith.constant 0 : index
      %c0_108 = arith.constant 0 : index
      %c0_109 = arith.constant 0 : index
      %182 = vector.load %arg10[%c0_107, %c0_108, %c0_109] : memref<4x8x32xf32, #tpu.memory_space<vmem>>, vector<1x8x32xf32>
      %183 = vector.shape_cast %182 : vector<1x8x32xf32> to vector<8x32xf32>
      %184 = vector.broadcast %181 : vector<8x1xf32> to vector<8x32xf32>
      %185 = arith.mulf %183, %184 : vector<8x32xf32>
      %c1_110 = arith.constant 1 : index
      %c0_111 = arith.constant 0 : index
      %c0_112 = arith.constant 0 : index
      %186 = vector.load %arg9[%c1_110, %c0_111, %c0_112] : memref<4x8x1xf32, #tpu.memory_space<vmem>>, vector<1x8x1xf32>
      %187 = vector.shape_cast %186 : vector<1x8x1xf32> to vector<8x1xf32>
      %188 = tpu.reciprocal %187 {approx = true} : vector<8x1xf32> -> vector<8x1xf32>
      %c1_113 = arith.constant 1 : index
      %c0_114 = arith.constant 0 : index
      %c0_115 = arith.constant 0 : index
      %189 = vector.load %arg10[%c1_113, %c0_114, %c0_115] : memref<4x8x32xf32, #tpu.memory_space<vmem>>, vector<1x8x32xf32>
      %190 = vector.shape_cast %189 : vector<1x8x32xf32> to vector<8x32xf32>
      %191 = vector.broadcast %188 : vector<8x1xf32> to vector<8x32xf32>
      %192 = arith.mulf %190, %191 : vector<8x32xf32>
      %c2_116 = arith.constant 2 : index
      %c0_117 = arith.constant 0 : index
      %c0_118 = arith.constant 0 : index
      %193 = vector.load %arg9[%c2_116, %c0_117, %c0_118] : memref<4x8x1xf32, #tpu.memory_space<vmem>>, vector<1x8x1xf32>
      %194 = vector.shape_cast %193 : vector<1x8x1xf32> to vector<8x1xf32>
      %195 = tpu.reciprocal %194 {approx = true} : vector<8x1xf32> -> vector<8x1xf32>
      %c2_119 = arith.constant 2 : index
      %c0_120 = arith.constant 0 : index
      %c0_121 = arith.constant 0 : index
      %196 = vector.load %arg10[%c2_119, %c0_120, %c0_121] : memref<4x8x32xf32, #tpu.memory_space<vmem>>, vector<1x8x32xf32>
      %197 = vector.shape_cast %196 : vector<1x8x32xf32> to vector<8x32xf32>
      %198 = vector.broadcast %195 : vector<8x1xf32> to vector<8x32xf32>
      %199 = arith.mulf %197, %198 : vector<8x32xf32>
      %c3_122 = arith.constant 3 : index
      %c0_123 = arith.constant 0 : index
      %c0_124 = arith.constant 0 : index
      %200 = vector.load %arg9[%c3_122, %c0_123, %c0_124] : memref<4x8x1xf32, #tpu.memory_space<vmem>>, vector<1x8x1xf32>
      %201 = vector.shape_cast %200 : vector<1x8x1xf32> to vector<8x1xf32>
      %202 = tpu.reciprocal %201 {approx = true} : vector<8x1xf32> -> vector<8x1xf32>
      %c3_125 = arith.constant 3 : index
      %c0_126 = arith.constant 0 : index
      %c0_127 = arith.constant 0 : index
      %203 = vector.load %arg10[%c3_125, %c0_126, %c0_127] : memref<4x8x32xf32, #tpu.memory_space<vmem>>, vector<1x8x32xf32>
      %204 = vector.shape_cast %203 : vector<1x8x32xf32> to vector<8x32xf32>
      %205 = vector.broadcast %202 : vector<8x1xf32> to vector<8x32xf32>
      %206 = arith.mulf %204, %205 : vector<8x32xf32>
      %207 = tpu.concatenate %185, %192, %199, %206 in 1 : vector<8x32xf32>, vector<8x32xf32>, vector<8x32xf32>, vector<8x32xf32> -> vector<8x128xf32>
      %208 = arith.truncf %207 : vector<8x128xf32> to vector<8x128xbf16>
      %c0_128 = arith.constant 0 : index
      %c0_129 = arith.constant 0 : index
      %c0_130 = arith.constant 0 : index
      %209 = vector.load %arg7[%c0_128, %c0_129, %c0_130] : memref<1x8x128xbf16, #tpu.memory_space<vmem>>, vector<1x8x128xbf16>
      %210 = vector.shape_cast %209 : vector<1x8x128xbf16> to vector<8x128xbf16>
      %211 = vector.shape_cast %208 : vector<8x128xbf16> to vector<1x8x128xbf16>
      tpu.vector_store %arg7[%c0_128, %c0_129, %c0_130], %211 {strides = array<i32>} : memref<1x8x128xbf16, #tpu.memory_space<vmem>>, vector<1x8x128xbf16>,
    } else {
    }
    return
  }
  func.func @transform_0(%arg0: i32, %arg1: i32, %arg2: i32) -> (i32, i32, i32) {
    %c0_i32 = arith.constant 0 : i32
    %c0_i32_0 = arith.constant 0 : i32
    return %arg0, %arg1, %c0_i32 : i32, i32, i32
  }
  func.func @transform_1(%arg0: i32, %arg1: i32, %arg2: i32) -> (i32, i32, i32) {
    %c1_i32 = arith.constant 1 : i32
    %c0_i32 = arith.constant 0 : i32
    return %arg0, %arg2, %c1_i32 : i32, i32, i32
  }
  func.func @transform_2(%arg0: i32, %arg1: i32, %arg2: i32) -> (i32, i32, i32) {
    %c2_i32 = arith.constant 2 : i32
    %c0_i32 = arith.constant 0 : i32
    return %arg0, %arg2, %c2_i32 : i32, i32, i32
  }
  func.func @transform_3(%arg0: i32, %arg1: i32, %arg2: i32) -> (i32, i32, i32) {
    %c0_i32 = arith.constant 0 : i32
    %c0_i32_0 = arith.constant 0 : i32
    return %arg0, %c0_i32, %arg2 : i32, i32, i32
  }
  func.func @transform_4(%arg0: i32, %arg1: i32, %arg2: i32) -> (i32, i32, i32) {
    %c0_i32 = arith.constant 0 : i32
    %c0_i32_0 = arith.constant 0 : i32
    return %arg0, %arg1, %c0_i32 : i32, i32, i32
  }
}

module attributes {stable_mosaic.version = 11 : i64} {
  func.func @_qkv_rope_kernel(%arg0: i32, %arg1: i32, %arg2: memref<16x128xf32, #tpu.memory_space<vmem>>, %arg3: memref<128x384xbf16, #tpu.memory_space<vmem>>, %arg4: memref<1x384xf32, #tpu.memory_space<vmem>>, %arg5: memref<16x32xf32, #tpu.memory_space<vmem>>, %arg6: memref<16x32xf32, #tpu.memory_space<vmem>>, %arg7: memref<16x384xbf16, #tpu.memory_space<vmem>>, %arg8: memref<16x384xf32, #tpu.memory_space<vmem>>) attributes {dimension_semantics = [#tpu.dimension_semantics<parallel>, #tpu.dimension_semantics<arbitrary>], iteration_bounds = array<i64: 1, 1>, scalar_prefetch = 0 : i64, scratch_operands = 1 : i64, tpu.core_type = #tpu.core_type<tc>, window_params = [{transform_indices = @transform_0, window_bounds = array<i64: 16, 128>}, {transform_indices = @transform_1, window_bounds = array<i64: 128, 384>}, {pipeline_mode = #tpu.pipeline_mode<synchronous>, transform_indices = @transform_2, window_bounds = array<i64: 1, 384>}, {transform_indices = @transform_3, window_bounds = array<i64: 16, 32>}, {transform_indices = @transform_4, window_bounds = array<i64: 16, 32>}, {transform_indices = @transform_5, window_bounds = array<i64: 16, 384>}]} {
    %c0_i32 = arith.constant 0 : i32
    %0 = arith.cmpi eq, %arg1, %c0_i32 : i32
    %1 = arith.extui %0 : i1 to i32
    %c0_i32_0 = arith.constant 0 : i32
    %2 = arith.cmpi ne, %1, %c0_i32_0 : i32
    scf.if %2 {
      %cst_10 = arith.constant 0.000000e+00 : f32
      %13 = vector.broadcast %cst_10 : f32 to vector<16x384xf32>
      %c0_11 = arith.constant 0 : index
      %c0_12 = arith.constant 0 : index
      %14 = vector.load %arg8[%c0_11, %c0_12] : memref<16x384xf32, #tpu.memory_space<vmem>>, vector<16x384xf32>
      tpu.vector_store %arg8[%c0_11, %c0_12], %13 {strides = array<i32>} : memref<16x384xf32, #tpu.memory_space<vmem>>, vector<16x384xf32>,
    } else {
    }
    %c0 = arith.constant 0 : index
    %c0_1 = arith.constant 0 : index
    %3 = vector.load %arg2[%c0, %c0_1] : memref<16x128xf32, #tpu.memory_space<vmem>>, vector<16x128xf32>
    %c0_2 = arith.constant 0 : index
    %c0_3 = arith.constant 0 : index
    %4 = vector.load %arg3[%c0_2, %c0_3] : memref<128x384xbf16, #tpu.memory_space<vmem>>, vector<128x384xbf16>
    %5 = arith.truncf %3 : vector<16x128xf32> to vector<16x128xbf16>
    %c0_4 = arith.constant 0 : index
    %c0_5 = arith.constant 0 : index
    %6 = vector.load %arg8[%c0_4, %c0_5] : memref<16x384xf32, #tpu.memory_space<vmem>>, vector<16x384xf32>
    %cst = arith.constant dense<0.000000e+00> : vector<16x384xf32>
    %7 = tpu.matmul %5, %4, %cst {dimension_numbers = #tpu.dot_dimension_numbers<[1], [0], [0], [1], [0, 0, 1, 1], [], []>} : vector<16x128xbf16>, vector<128x384xbf16>, vector<16x384xf32> -> vector<16x384xf32>
    %8 = arith.addf %6, %7 : vector<16x384xf32>
    %c0_6 = arith.constant 0 : index
    %c0_7 = arith.constant 0 : index
    %9 = vector.load %arg8[%c0_6, %c0_7] : memref<16x384xf32, #tpu.memory_space<vmem>>, vector<16x384xf32>
    tpu.vector_store %arg8[%c0_6, %c0_7], %8 {strides = array<i32>} : memref<16x384xf32, #tpu.memory_space<vmem>>, vector<16x384xf32>,
    %c0_i32_8 = arith.constant 0 : i32
    %10 = arith.cmpi eq, %arg1, %c0_i32_8 : i32
    %11 = arith.extui %10 : i1 to i32
    %c0_i32_9 = arith.constant 0 : i32
    %12 = arith.cmpi ne, %11, %c0_i32_9 : i32
    scf.if %12 {
      %c0_10 = arith.constant 0 : index
      %c0_11 = arith.constant 0 : index
      %13 = vector.load %arg8[%c0_10, %c0_11] : memref<16x384xf32, #tpu.memory_space<vmem>>, vector<16x384xf32>
      %c0_12 = arith.constant 0 : index
      %c0_13 = arith.constant 0 : index
      %14 = vector.load %arg4[%c0_12, %c0_13] : memref<1x384xf32, #tpu.memory_space<vmem>>, vector<1x384xf32>
      %15 = vector.broadcast %14 : vector<1x384xf32> to vector<16x384xf32>
      %16 = arith.addf %13, %15 : vector<16x384xf32>
      %17 = vector.extract_strided_slice %16 {offsets = [0, 0], sizes = [16, 128], strides = [1, 1]} : vector<16x384xf32> to vector<16x128xf32>
      %18 = vector.extract_strided_slice %16 {offsets = [0, 128], sizes = [16, 128], strides = [1, 1]} : vector<16x384xf32> to vector<16x128xf32>
      %19 = vector.extract_strided_slice %16 {offsets = [0, 256], sizes = [16, 128], strides = [1, 1]} : vector<16x384xf32> to vector<16x128xf32>
      %c0_14 = arith.constant 0 : index
      %c0_15 = arith.constant 0 : index
      %20 = vector.load %arg5[%c0_14, %c0_15] : memref<16x32xf32, #tpu.memory_space<vmem>>, vector<16x32xf32>
      %c0_16 = arith.constant 0 : index
      %c0_17 = arith.constant 0 : index
      %21 = vector.load %arg6[%c0_16, %c0_17] : memref<16x32xf32, #tpu.memory_space<vmem>>, vector<16x32xf32>
      %cst_18 = arith.constant 0.176776692 : f32
      %22 = vector.broadcast %cst_18 : f32 to vector<16x32xf32>
      %23 = arith.mulf %20, %22 : vector<16x32xf32>
      %cst_19 = arith.constant 0.176776692 : f32
      %24 = vector.broadcast %cst_19 : f32 to vector<16x32xf32>
      %25 = arith.mulf %21, %24 : vector<16x32xf32>
      %26 = vector.extract_strided_slice %17 {offsets = [0, 0], sizes = [16, 32], strides = [1, 1]} : vector<16x128xf32> to vector<16x32xf32>
      %27 = vector.extract_strided_slice %26 {offsets = [0, 16], sizes = [16, 16], strides = [1, 1]} : vector<16x32xf32> to vector<16x16xf32>
      %28 = vector.extract_strided_slice %26 {offsets = [0, 0], sizes = [16, 16], strides = [1, 1]} : vector<16x32xf32> to vector<16x16xf32>
      %29 = tpu.concatenate %27, %28 in 1 : vector<16x16xf32>, vector<16x16xf32> -> vector<16x32xf32>
      %30 = arith.mulf %26, %23 : vector<16x32xf32>
      %31 = arith.mulf %29, %25 : vector<16x32xf32>
      %32 = arith.addf %30, %31 : vector<16x32xf32>
      %33 = vector.extract_strided_slice %17 {offsets = [0, 32], sizes = [16, 32], strides = [1, 1]} : vector<16x128xf32> to vector<16x32xf32>
      %34 = vector.extract_strided_slice %33 {offsets = [0, 16], sizes = [16, 16], strides = [1, 1]} : vector<16x32xf32> to vector<16x16xf32>
      %35 = vector.extract_strided_slice %33 {offsets = [0, 0], sizes = [16, 16], strides = [1, 1]} : vector<16x32xf32> to vector<16x16xf32>
      %36 = tpu.concatenate %34, %35 in 1 : vector<16x16xf32>, vector<16x16xf32> -> vector<16x32xf32>
      %37 = arith.mulf %33, %23 : vector<16x32xf32>
      %38 = arith.mulf %36, %25 : vector<16x32xf32>
      %39 = arith.addf %37, %38 : vector<16x32xf32>
      %40 = vector.extract_strided_slice %17 {offsets = [0, 64], sizes = [16, 32], strides = [1, 1]} : vector<16x128xf32> to vector<16x32xf32>
      %41 = vector.extract_strided_slice %40 {offsets = [0, 16], sizes = [16, 16], strides = [1, 1]} : vector<16x32xf32> to vector<16x16xf32>
      %42 = vector.extract_strided_slice %40 {offsets = [0, 0], sizes = [16, 16], strides = [1, 1]} : vector<16x32xf32> to vector<16x16xf32>
      %43 = tpu.concatenate %41, %42 in 1 : vector<16x16xf32>, vector<16x16xf32> -> vector<16x32xf32>
      %44 = arith.mulf %40, %23 : vector<16x32xf32>
      %45 = arith.mulf %43, %25 : vector<16x32xf32>
      %46 = arith.addf %44, %45 : vector<16x32xf32>
      %47 = vector.extract_strided_slice %17 {offsets = [0, 96], sizes = [16, 32], strides = [1, 1]} : vector<16x128xf32> to vector<16x32xf32>
      %48 = vector.extract_strided_slice %47 {offsets = [0, 16], sizes = [16, 16], strides = [1, 1]} : vector<16x32xf32> to vector<16x16xf32>
      %49 = vector.extract_strided_slice %47 {offsets = [0, 0], sizes = [16, 16], strides = [1, 1]} : vector<16x32xf32> to vector<16x16xf32>
      %50 = tpu.concatenate %48, %49 in 1 : vector<16x16xf32>, vector<16x16xf32> -> vector<16x32xf32>
      %51 = arith.mulf %47, %23 : vector<16x32xf32>
      %52 = arith.mulf %50, %25 : vector<16x32xf32>
      %53 = arith.addf %51, %52 : vector<16x32xf32>
      %54 = tpu.concatenate %32, %39, %46, %53 in 1 : vector<16x32xf32>, vector<16x32xf32>, vector<16x32xf32>, vector<16x32xf32> -> vector<16x128xf32>
      %55 = vector.extract_strided_slice %18 {offsets = [0, 0], sizes = [16, 32], strides = [1, 1]} : vector<16x128xf32> to vector<16x32xf32>
      %56 = vector.extract_strided_slice %55 {offsets = [0, 16], sizes = [16, 16], strides = [1, 1]} : vector<16x32xf32> to vector<16x16xf32>
      %57 = vector.extract_strided_slice %55 {offsets = [0, 0], sizes = [16, 16], strides = [1, 1]} : vector<16x32xf32> to vector<16x16xf32>
      %58 = tpu.concatenate %56, %57 in 1 : vector<16x16xf32>, vector<16x16xf32> -> vector<16x32xf32>
      %59 = arith.mulf %55, %20 : vector<16x32xf32>
      %60 = arith.mulf %58, %21 : vector<16x32xf32>
      %61 = arith.addf %59, %60 : vector<16x32xf32>
      %62 = vector.extract_strided_slice %18 {offsets = [0, 32], sizes = [16, 32], strides = [1, 1]} : vector<16x128xf32> to vector<16x32xf32>
      %63 = vector.extract_strided_slice %62 {offsets = [0, 16], sizes = [16, 16], strides = [1, 1]} : vector<16x32xf32> to vector<16x16xf32>
      %64 = vector.extract_strided_slice %62 {offsets = [0, 0], sizes = [16, 16], strides = [1, 1]} : vector<16x32xf32> to vector<16x16xf32>
      %65 = tpu.concatenate %63, %64 in 1 : vector<16x16xf32>, vector<16x16xf32> -> vector<16x32xf32>
      %66 = arith.mulf %62, %20 : vector<16x32xf32>
      %67 = arith.mulf %65, %21 : vector<16x32xf32>
      %68 = arith.addf %66, %67 : vector<16x32xf32>
      %69 = vector.extract_strided_slice %18 {offsets = [0, 64], sizes = [16, 32], strides = [1, 1]} : vector<16x128xf32> to vector<16x32xf32>
      %70 = vector.extract_strided_slice %69 {offsets = [0, 16], sizes = [16, 16], strides = [1, 1]} : vector<16x32xf32> to vector<16x16xf32>
      %71 = vector.extract_strided_slice %69 {offsets = [0, 0], sizes = [16, 16], strides = [1, 1]} : vector<16x32xf32> to vector<16x16xf32>
      %72 = tpu.concatenate %70, %71 in 1 : vector<16x16xf32>, vector<16x16xf32> -> vector<16x32xf32>
      %73 = arith.mulf %69, %20 : vector<16x32xf32>
      %74 = arith.mulf %72, %21 : vector<16x32xf32>
      %75 = arith.addf %73, %74 : vector<16x32xf32>
      %76 = vector.extract_strided_slice %18 {offsets = [0, 96], sizes = [16, 32], strides = [1, 1]} : vector<16x128xf32> to vector<16x32xf32>
      %77 = vector.extract_strided_slice %76 {offsets = [0, 16], sizes = [16, 16], strides = [1, 1]} : vector<16x32xf32> to vector<16x16xf32>
      %78 = vector.extract_strided_slice %76 {offsets = [0, 0], sizes = [16, 16], strides = [1, 1]} : vector<16x32xf32> to vector<16x16xf32>
      %79 = tpu.concatenate %77, %78 in 1 : vector<16x16xf32>, vector<16x16xf32> -> vector<16x32xf32>
      %80 = arith.mulf %76, %20 : vector<16x32xf32>
      %81 = arith.mulf %79, %21 : vector<16x32xf32>
      %82 = arith.addf %80, %81 : vector<16x32xf32>
      %83 = tpu.concatenate %61, %68, %75, %82 in 1 : vector<16x32xf32>, vector<16x32xf32>, vector<16x32xf32>, vector<16x32xf32> -> vector<16x128xf32>
      %84 = tpu.concatenate %54, %83, %19 in 1 : vector<16x128xf32>, vector<16x128xf32>, vector<16x128xf32> -> vector<16x384xf32>
      %85 = arith.truncf %84 : vector<16x384xf32> to vector<16x384xbf16>
      %c0_20 = arith.constant 0 : index
      %c0_21 = arith.constant 0 : index
      %86 = vector.load %arg7[%c0_20, %c0_21] : memref<16x384xbf16, #tpu.memory_space<vmem>>, vector<16x384xbf16>
      tpu.vector_store %arg7[%c0_20, %c0_21], %85 {strides = array<i32>} : memref<16x384xbf16, #tpu.memory_space<vmem>>, vector<16x384xbf16>,
    } else {
    }
    return
  }
  func.func @transform_0(%arg0: i32, %arg1: i32) -> (i32, i32) {
    %c0_i32 = arith.constant 0 : i32
    return %arg0, %arg1 : i32, i32
  }
  func.func @transform_1(%arg0: i32, %arg1: i32) -> (i32, i32) {
    %c0_i32 = arith.constant 0 : i32
    %c0_i32_0 = arith.constant 0 : i32
    return %arg1, %c0_i32 : i32, i32
  }
  func.func @transform_2(%arg0: i32, %arg1: i32) -> (i32, i32) {
    %c0_i32 = arith.constant 0 : i32
    %c0_i32_0 = arith.constant 0 : i32
    %c0_i32_1 = arith.constant 0 : i32
    return %c0_i32, %c0_i32_0 : i32, i32
  }
  func.func @transform_3(%arg0: i32, %arg1: i32) -> (i32, i32) {
    %c0_i32 = arith.constant 0 : i32
    %c0_i32_0 = arith.constant 0 : i32
    return %arg0, %c0_i32 : i32, i32
  }
  func.func @transform_4(%arg0: i32, %arg1: i32) -> (i32, i32) {
    %c0_i32 = arith.constant 0 : i32
    %c0_i32_0 = arith.constant 0 : i32
    return %arg0, %c0_i32 : i32, i32
  }
  func.func @transform_5(%arg0: i32, %arg1: i32) -> (i32, i32) {
    %c0_i32 = arith.constant 0 : i32
    %c0_i32_0 = arith.constant 0 : i32
    return %arg0, %c0_i32 : i32, i32
  }
}

module attributes {stable_mosaic.version = 11 : i64} {
  func.func @_linear_add_ln_kernel(%arg0: i32, %arg1: i32, %arg2: memref<16x256xbf16, #tpu.memory_space<vmem>>, %arg3: memref<256x128xbf16, #tpu.memory_space<vmem>>, %arg4: memref<1x128xf32, #tpu.memory_space<vmem>>, %arg5: memref<16x128xbf16, #tpu.memory_space<vmem>>, %arg6: memref<1x128xf32, #tpu.memory_space<vmem>>, %arg7: memref<1x128xf32, #tpu.memory_space<vmem>>, %arg8: memref<16x128xf32, #tpu.memory_space<vmem>>, %arg9: memref<16x128xf32, #tpu.memory_space<vmem>>) attributes {dimension_semantics = [#tpu.dimension_semantics<parallel>, #tpu.dimension_semantics<arbitrary>], iteration_bounds = array<i64: 1, 1>, scalar_prefetch = 0 : i64, scratch_operands = 1 : i64, tpu.core_type = #tpu.core_type<tc>, window_params = [{transform_indices = @transform_0, window_bounds = array<i64: 16, 256>}, {transform_indices = @transform_1, window_bounds = array<i64: 256, 128>}, {pipeline_mode = #tpu.pipeline_mode<synchronous>, transform_indices = @transform_2, window_bounds = array<i64: 1, 128>}, {transform_indices = @transform_3, window_bounds = array<i64: 16, 128>}, {pipeline_mode = #tpu.pipeline_mode<synchronous>, transform_indices = @transform_4, window_bounds = array<i64: 1, 128>}, {pipeline_mode = #tpu.pipeline_mode<synchronous>, transform_indices = @transform_5, window_bounds = array<i64: 1, 128>}, {transform_indices = @transform_6, window_bounds = array<i64: 16, 128>}]} {
    %c0_i32 = arith.constant 0 : i32
    %0 = arith.cmpi eq, %arg1, %c0_i32 : i32
    %1 = arith.extui %0 : i1 to i32
    %c0_i32_0 = arith.constant 0 : i32
    %2 = arith.cmpi ne, %1, %c0_i32_0 : i32
    scf.if %2 {
      %cst_10 = arith.constant 0.000000e+00 : f32
      %12 = vector.broadcast %cst_10 : f32 to vector<16x128xf32>
      %c0_11 = arith.constant 0 : index
      %c0_12 = arith.constant 0 : index
      %13 = vector.load %arg9[%c0_11, %c0_12] : memref<16x128xf32, #tpu.memory_space<vmem>>, vector<16x128xf32>
      tpu.vector_store %arg9[%c0_11, %c0_12], %12 {strides = array<i32>} : memref<16x128xf32, #tpu.memory_space<vmem>>, vector<16x128xf32>,
    } else {
    }
    %c0 = arith.constant 0 : index
    %c0_1 = arith.constant 0 : index
    %3 = vector.load %arg2[%c0, %c0_1] : memref<16x256xbf16, #tpu.memory_space<vmem>>, vector<16x256xbf16>
    %c0_2 = arith.constant 0 : index
    %c0_3 = arith.constant 0 : index
    %4 = vector.load %arg3[%c0_2, %c0_3] : memref<256x128xbf16, #tpu.memory_space<vmem>>, vector<256x128xbf16>
    %c0_4 = arith.constant 0 : index
    %c0_5 = arith.constant 0 : index
    %5 = vector.load %arg9[%c0_4, %c0_5] : memref<16x128xf32, #tpu.memory_space<vmem>>, vector<16x128xf32>
    %cst = arith.constant dense<0.000000e+00> : vector<16x128xf32>
    %6 = tpu.matmul %3, %4, %cst {dimension_numbers = #tpu.dot_dimension_numbers<[1], [0], [0], [1], [0, 0, 1, 1], [], []>} : vector<16x256xbf16>, vector<256x128xbf16>, vector<16x128xf32> -> vector<16x128xf32>
    %7 = arith.addf %5, %6 : vector<16x128xf32>
    %c0_6 = arith.constant 0 : index
    %c0_7 = arith.constant 0 : index
    %8 = vector.load %arg9[%c0_6, %c0_7] : memref<16x128xf32, #tpu.memory_space<vmem>>, vector<16x128xf32>
    tpu.vector_store %arg9[%c0_6, %c0_7], %7 {strides = array<i32>} : memref<16x128xf32, #tpu.memory_space<vmem>>, vector<16x128xf32>,
    %c0_i32_8 = arith.constant 0 : i32
    %9 = arith.cmpi eq, %arg1, %c0_i32_8 : i32
    %10 = arith.extui %9 : i1 to i32
    %c0_i32_9 = arith.constant 0 : i32
    %11 = arith.cmpi ne, %10, %c0_i32_9 : i32
    scf.if %11 {
      %c0_10 = arith.constant 0 : index
      %c0_11 = arith.constant 0 : index
      %12 = vector.load %arg9[%c0_10, %c0_11] : memref<16x128xf32, #tpu.memory_space<vmem>>, vector<16x128xf32>
      %c0_12 = arith.constant 0 : index
      %c0_13 = arith.constant 0 : index
      %13 = vector.load %arg4[%c0_12, %c0_13] : memref<1x128xf32, #tpu.memory_space<vmem>>, vector<1x128xf32>
      %14 = vector.broadcast %13 : vector<1x128xf32> to vector<16x128xf32>
      %15 = arith.addf %12, %14 : vector<16x128xf32>
      %c0_14 = arith.constant 0 : index
      %c0_15 = arith.constant 0 : index
      %16 = vector.load %arg5[%c0_14, %c0_15] : memref<16x128xbf16, #tpu.memory_space<vmem>>, vector<16x128xbf16>
      %17 = arith.extf %16 : vector<16x128xbf16> to vector<16x128xf32>
      %18 = arith.addf %15, %17 : vector<16x128xf32>
      %cst_16 = arith.constant dense<0.000000e+00> : vector<16xf32>
      %19 = vector.multi_reduction <add>, %18, %cst_16 [1] : vector<16x128xf32> to vector<16xf32>
      %20 = vector.shape_cast %19 : vector<16xf32> to vector<16x1xf32>
      %cst_17 = arith.constant 1.280000e+02 : f32
      %21 = vector.broadcast %cst_17 : f32 to vector<16x1xf32>
      %22 = arith.divf %20, %21 : vector<16x1xf32>
      %23 = vector.broadcast %22 : vector<16x1xf32> to vector<16x128xf32>
      %24 = arith.subf %18, %23 : vector<16x128xf32>
      %25 = arith.mulf %24, %24 : vector<16x128xf32>
      %cst_18 = arith.constant dense<0.000000e+00> : vector<16xf32>
      %26 = vector.multi_reduction <add>, %25, %cst_18 [1] : vector<16x128xf32> to vector<16xf32>
      %27 = vector.shape_cast %26 : vector<16xf32> to vector<16x1xf32>
      %cst_19 = arith.constant 1.280000e+02 : f32
      %28 = vector.broadcast %cst_19 : f32 to vector<16x1xf32>
      %29 = arith.divf %27, %28 : vector<16x1xf32>
      %30 = vector.broadcast %22 : vector<16x1xf32> to vector<16x128xf32>
      %31 = arith.subf %18, %30 : vector<16x128xf32>
      %cst_20 = arith.constant 9.99999997E-7 : f32
      %32 = vector.broadcast %cst_20 : f32 to vector<16x1xf32>
      %33 = arith.addf %29, %32 : vector<16x1xf32>
      %34 = math.rsqrt %33 : vector<16x1xf32>
      %35 = vector.broadcast %34 : vector<16x1xf32> to vector<16x128xf32>
      %36 = arith.mulf %31, %35 : vector<16x128xf32>
      %c0_21 = arith.constant 0 : index
      %c0_22 = arith.constant 0 : index
      %37 = vector.load %arg6[%c0_21, %c0_22] : memref<1x128xf32, #tpu.memory_space<vmem>>, vector<1x128xf32>
      %38 = vector.broadcast %37 : vector<1x128xf32> to vector<16x128xf32>
      %39 = arith.mulf %36, %38 : vector<16x128xf32>
      %c0_23 = arith.constant 0 : index
      %c0_24 = arith.constant 0 : index
      %40 = vector.load %arg7[%c0_23, %c0_24] : memref<1x128xf32, #tpu.memory_space<vmem>>, vector<1x128xf32>
      %41 = vector.broadcast %40 : vector<1x128xf32> to vector<16x128xf32>
      %42 = arith.addf %39, %41 : vector<16x128xf32>
      %c0_25 = arith.constant 0 : index
      %c0_26 = arith.constant 0 : index
      %43 = vector.load %arg8[%c0_25, %c0_26] : memref<16x128xf32, #tpu.memory_space<vmem>>, vector<16x128xf32>
      tpu.vector_store %arg8[%c0_25, %c0_26], %42 {strides = array<i32>} : memref<16x128xf32, #tpu.memory_space<vmem>>, vector<16x128xf32>,
    } else {
    }
    return
  }
  func.func @transform_0(%arg0: i32, %arg1: i32) -> (i32, i32) {
    %c0_i32 = arith.constant 0 : i32
    return %arg0, %arg1 : i32, i32
  }
  func.func @transform_1(%arg0: i32, %arg1: i32) -> (i32, i32) {
    %c0_i32 = arith.constant 0 : i32
    %c0_i32_0 = arith.constant 0 : i32
    return %arg1, %c0_i32 : i32, i32
  }
  func.func @transform_2(%arg0: i32, %arg1: i32) -> (i32, i32) {
    %c0_i32 = arith.constant 0 : i32
    %c0_i32_0 = arith.constant 0 : i32
    %c0_i32_1 = arith.constant 0 : i32
    return %c0_i32, %c0_i32_0 : i32, i32
  }
  func.func @transform_3(%arg0: i32, %arg1: i32) -> (i32, i32) {
    %c0_i32 = arith.constant 0 : i32
    %c0_i32_0 = arith.constant 0 : i32
    return %arg0, %c0_i32 : i32, i32
  }
  func.func @transform_4(%arg0: i32, %arg1: i32) -> (i32, i32) {
    %c0_i32 = arith.constant 0 : i32
    %c0_i32_0 = arith.constant 0 : i32
    %c0_i32_1 = arith.constant 0 : i32
    return %c0_i32, %c0_i32_0 : i32, i32
  }
  func.func @transform_5(%arg0: i32, %arg1: i32) -> (i32, i32) {
    %c0_i32 = arith.constant 0 : i32
    %c0_i32_0 = arith.constant 0 : i32
    %c0_i32_1 = arith.constant 0 : i32
    return %c0_i32, %c0_i32_0 : i32, i32
  }
  func.func @transform_6(%arg0: i32, %arg1: i32) -> (i32, i32) {
    %c0_i32 = arith.constant 0 : i32
    %c0_i32_0 = arith.constant 0 : i32
    return %arg0, %c0_i32 : i32, i32
  }
}

</mosaic_0001>

<bundles_post_ra>
// kernel: decoder_layer_forward.7
= control target key start
LH: loop header
LB: loop body
LE: loop exit
PB: predicated region body
PF: predicated region fallthrough
CT: control target
= control target key end

     0   :  { %v287_v0 = vmov 0.0   ;;  %vm288_vm0 = vmmov 0   ;;  %s369_s1 = inlined_call_operand.vmem [shape: bf16[128,128], index: 1, kind: input, shape index: {}]   ;;  %s370_s0 = inlined_call_operand.vmem [shape: bf16[16,128], index: 0, kind: input, shape index: {}]   ;;  %s371_s2 = inlined_call_operand.vmem [shape: f32[1,128], index: 2, kind: input, shape index: {}]   ;;  %s372_s3 = inlined_call_operand.vmem [shape: f32[16,128], index: 3, kind: input, shape index: {}]   ;;  %s373_s4 = inlined_call_operand.vmem [shape: f32[1,128], index: 4, kind: input, shape index: {}]   ;;  %s374_s5 = inlined_call_operand.vmem [shape: f32[1,128], index: 5, kind: input, shape index: {}]   ;;  %s375_s6 = inlined_call_operand.vmem [shape: bf16[16,128], index: 6, kind: output, shape index: {}]  }
   0x1   :  { %252 = vmatprep.subr.bf16.mxu0 %v287_v0  ;;  %v274_v1 = vld [vmem:[%s369_s1] sm:$0xff]   ;;  %268 = vmatprep.mubr.msk.bf16.mxu0 %vm288_vm0, %v287_v0  ;;  %v275_v2 = vld [vmem:[%s369_s1 + $0x8] sm:$0xff]   ;;  %v276_v3 = vld [vmem:[%s369_s1 + $0x10] sm:$0xff]  }
   0x2   :  { %253 = vmatpush3.bf16.msra.mxu0 %v274_v1  ;;  %v277_v4 = vld [vmem:[%s369_s1 + $0x18] sm:$0xff]   ;;  %v278_v5 = vld [vmem:[%s369_s1 + $0x20] sm:$0xff]   ;;  %v279_v6 = vld [vmem:[%s369_s1 + $0x28] sm:$0xff]  }
   0x3   :  { %254 = vmatprep.subr.bf16.mxu0 %v287_v0  ;;  %v280_v7 = vld [vmem:[%s369_s1 + $0x30] sm:$0xff]   ;;  %v281_v8 = vld [vmem:[%s369_s1 + $0x38] sm:$0xff]   ;;  %v282_v9 = vld [vmem:[%s370_s0] sm:$0xff]  }
   0x4   :  { %v231_v10 = vld [vmem:[%s371_s2] ss:$0 sm:$0xff]  ;;  %v164_v19 = vld [vmem:[%s372_s3 + $0x8] sm:$0xff] }
   0x5   :  { %v163_v12 = vld [vmem:[%s372_s3] sm:$0xff] }
   0x6   :  { %255 = vmatpush3.bf16.msra.mxu0 %v275_v2  ;;  %v232_v37 = vld [vmem:[%s373_s4] ss:$0 sm:$0xff] }
   0x7   :  { %256 = vmatprep.subr.bf16.mxu0 %v287_v0  ;;  %v233_v41 = vld [vmem:[%s374_s5] ss:$0 sm:$0xff] }
   0xa   :  { %257 = vmatpush3.bf16.msra.mxu0 %v276_v3 }
   0xb   :  { %258 = vmatprep.subr.bf16.mxu0 %v287_v0 }
   0xe   :  { %259 = vmatpush3.bf16.msra.mxu0 %v277_v4 }
   0xf   :  { %260 = vmatprep.subr.bf16.mxu0 %v287_v0 }
  0x12   :  { %261 = vmatpush3.bf16.msra.mxu0 %v278_v5 }
  0x13   :  { %262 = vmatprep.subr.bf16.mxu0 %v287_v0 }
  0x16   :  { %263 = vmatpush3.bf16.msra.mxu0 %v279_v6 }
  0x17   :  { %264 = vmatprep.subr.bf16.mxu0 %v287_v0 }
  0x1a   :  { %265 = vmatpush3.bf16.msra.mxu0 %v280_v7 }
  0x1b   :  { %266 = vmatprep.subr.bf16.mxu0 %v287_v0 }
  0x1e   :  { %267 = vmatpush3.bf16.msra.mxu0 %v281_v8 }
  0x21   :  { %269 = vmatmul.mubr.bf16.vlgmr.msra.gmra.mrb[0].mxu0 %v282_v9 }
  0xf4   :  { %v138_v11 = vpop.f32.mrb[0].mxu0 }
  0xf5   :  { %v161_v13 = vadd.f32 %v231_v10, %v138_v11  ;;  %v270_v14 = vpop.f32.mrb[1].mxu0 }
  0xf6   :  { %v141_v15 = vpop.f32.mrb[2].mxu0 }
  0xf7   :  { %v162_v16 = vadd.f32 %v231_v10, %v141_v15  ;;  %v271_v17 = vpop.f32.mrb[3].mxu0  ;;  %v165_v18 = vadd.f32 %v163_v12, %v161_v13 }
  0xf9   :  { %167 = vadd.xlane.f32.xlu0 %v165_v18  ;;  %v166_v20 = vadd.f32 %v164_v19, %v162_v16 }
  0xfd   :  { %169 = vadd.xlane.f32.xlu0 %v166_v20 }
 0x186   :  { %v168_v21 = vpop.xlane.xlu0 %167 }
 0x187   :  { %v172_v22 = vmul.f32 0.0078125, %v168_v21 }
 0x189   :  { %v174_v23 = vsub.f32 %v165_v18, %v172_v22 }
 0x18a   :  { %v170_v24 = vpop.xlane.xlu0 %169 }
 0x18b   :  { %v173_v25 = vmul.f32 0.0078125, %v170_v24  ;;  %v176_v26 = vmul.f32 %v174_v23, %v174_v23 }
 0x18d   :  { %v175_v27 = vsub.f32 %v166_v20, %v173_v25  ;;  %178 = vadd.xlane.f32.xlu1 %v176_v26 }
 0x18f   :  { %v177_v28 = vmul.f32 %v175_v27, %v175_v27 }
 0x191   :  { %180 = vadd.xlane.f32.xlu1 %v177_v28 }
 0x21a   :  { %v179_v29 = vpop.xlane.xlu1 %178 }
 0x21b   :  { %v182_v30 = vmul.f32 0.0078125, %v179_v29 }
 0x21d   :  { %v184_v31 = vadd.f32 1e-06, %v182_v30 }
 0x21e   :  { %v181_v32 = vpop.xlane.xlu1 %180 }
 0x21f   :  { %283 = vrsqrt.f32 %v184_v31  ;;  %v183_v33 = vmul.f32 0.0078125, %v181_v32 }
 0x221   :  { %v185_v34 = vadd.f32 1e-06, %v183_v33 }
 0x223   :  { %285 = vrsqrt.f32 %v185_v34 }
 0x229   :  { %v284_v35 = vpop.eup %283 }
 0x22a   :  { %v188_v36 = vmul.f32 %v284_v35, %v174_v23 }
 0x22c   :  { %v197_v39 = vmul.f32 %v232_v37, %v188_v36 }
 0x22d   :  { %v286_v38 = vpop.eup %285 }
 0x22e   :  { %v189_v40 = vmul.f32 %v286_v38, %v175_v27  ;;  %v206_v43 = vadd.f32 %v233_v41, %v197_v39 }
 0x230   :  { %v198_v42 = vmul.f32 %v232_v37, %v189_v40 }
 0x232   :  { %v207_v44 = vadd.f32 %v233_v41, %v198_v42 }
 0x234   :  { %v241_v45 = vpack.c.bf16 %v207_v44, %v206_v43 }
 0x236   :  { %242 = vst [vmem:[%s375_s6] sm:$0xff] %v241_v45  }

// kernel: decoder_layer_forward.8
= control target key start
LH: loop header
LB: loop body
LE: loop exit
PB: predicated region body
PF: predicated region fallthrough
CT: control target
= control target key end

     0   :  { %v274_v1 = vmov 0   ;;  %v191_v18 = vlaneseq  ;;  %s355_s1 = inlined_call_operand.vmem [shape: bf16[128,256], index: 1, kind: input, shape index: {}]   ;;  %s356_s0 = inlined_call_operand.vmem [shape: bf16[16,128], index: 0, kind: input, shape index: {}]   ;;  %s357_s2 = inlined_call_operand.vmem [shape: f32[1,256], index: 2, kind: input, shape index: {}]   ;;  %s358_s3 = inlined_call_operand.vmem [shape: bf16[16,256], index: 3, kind: output, shape index: {}]  }
   0x1   :  { %v249_v0 = vld [vmem:[%s355_s1 + $0x4] ss:$8 sps:$4 sm:$0xff]   ;;  %163 = vmatprep.mubr.bf16.mxu0 %v274_v1  ;;  %v251_v2 = vld [vmem:[%s355_s1] ss:$8 sps:$4 sm:$0xff]   ;;  %v252_v3 = vld [vmem:[%s355_s1 + $0x14] ss:$8 sps:$4 sm:$0xff]  }
   0x2   :  { %131 = vmatprep.subr.bf16.mxu0 %v249_v0  ;;  %v254_v4 = vld [vmem:[%s355_s1 + $0x10] ss:$8 sps:$4 sm:$0xff]   ;;  %v255_v5 = vld [vmem:[%s355_s1 + $0x24] ss:$8 sps:$4 sm:$0xff]   ;;  %v257_v6 = vld [vmem:[%s355_s1 + $0x20] ss:$8 sps:$4 sm:$0xff]  }
   0x3   :  { %132 = vmatpush1.bf16.msra.mxu0 %v251_v2  ;;  %v258_v7 = vld [vmem:[%s355_s1 + $0x34] ss:$8 sps:$4 sm:$0xff]   ;;  %v260_v8 = vld [vmem:[%s355_s1 + $0x30] ss:$8 sps:$4 sm:$0xff]   ;;  %v261_v9 = vld [vmem:[%s355_s1 + $0x44] ss:$8 sps:$4 sm:$0xff]  }
   0x4   :  { %133 = vmatprep.subr.bf16.mxu0 %v252_v3  ;;  %v263_v10 = vld [vmem:[%s355_s1 + $0x40] ss:$8 sps:$4 sm:$0xff]   ;;  %v264_v11 = vld [vmem:[%s355_s1 + $0x54] ss:$8 sps:$4 sm:$0xff]   ;;  %v266_v12 = vld [vmem:[%s355_s1 + $0x50] ss:$8 sps:$4 sm:$0xff]  }
   0x5   :  { %v267_v13 = vld [vmem:[%s355_s1 + $0x64] ss:$8 sps:$4 sm:$0xff]   ;;  %v269_v14 = vld [vmem:[%s355_s1 + $0x60] ss:$8 sps:$4 sm:$0xff]   ;;  %v270_v15 = vld [vmem:[%s355_s1 + $0x74] ss:$8 sps:$4 sm:$0xff]  }
   0x6   :  { %v272_v16 = vld [vmem:[%s355_s1 + $0x70] ss:$8 sps:$4 sm:$0xff]   ;;  %v273_v17 = vld [vmem:[%s356_s0] sm:$0xff]   ;;  %v192_v19 = vshrl.u32 %v191_v18, 7 }
   0x7   :  { %134 = vmatpush1.bf16.msra.mxu0 %v254_v4  ;;  %v189_v21 = vld [vmem:[%s357_s2] sm:$0x3] }
   0x8   :  { %135 = vmatprep.subr.bf16.mxu0 %v255_v5  ;;  %v193_v20 = vsub.s32 0, %v192_v19  ;;  %v197_v22 = vsub.s32 1, %v192_v19 }
   0xa   :  { %v194_v23 = vrot.slane %v189_v21, %v193_v20  ;;  %v198_v24 = vrot.slane %v189_v21, %v197_v22 }
   0xb   :  { %136 = vmatpush1.bf16.msra.mxu0 %v257_v6 }
   0xc   :  { %137 = vmatprep.subr.bf16.mxu0 %v258_v7 }
   0xf   :  { %138 = vmatpush1.bf16.msra.mxu0 %v260_v8 }
  0x10   :  { %139 = vmatprep.subr.bf16.mxu0 %v261_v9 }
  0x13   :  { %140 = vmatpush1.bf16.msra.mxu0 %v263_v10 }
  0x14   :  { %141 = vmatprep.subr.bf16.mxu0 %v264_v11 }
  0x17   :  { %142 = vmatpush1.bf16.msra.mxu0 %v266_v12 }
  0x18   :  { %143 = vmatprep.subr.bf16.mxu0 %v267_v13 }
  0x1b   :  { %144 = vmatpush1.bf16.msra.mxu0 %v269_v14 }
  0x1c   :  { %145 = vmatprep.subr.bf16.mxu0 %v270_v15 }
  0x1f   :  { %146 = vmatpush1.bf16.msra.mxu0 %v272_v16 }
  0x22   :  { %164 = vmatmul.mubr.bf16.vlgmr.msra.gmra.mrb[0].mxu0 %v273_v17 }
  0xf5   :  { %v165_v25 = vpop.f32.mrb[0].mxu0 }
  0xf6   :  { %v201_v26 = vadd.f32 %v194_v23, %v165_v25  ;;  %v167_v27 = vpop.f32.mrb[1].mxu0 }
  0xf7   :  { %v202_v28 = vadd.f32 %v198_v24, %v167_v27  ;;  %v169_v29 = vpop.f32.mrb[2].mxu0 }
  0xf8   :  { %v205_v30 = vmax.f32 %v201_v26, 0.0  ;;  %v203_v31 = vadd.f32 %v194_v23, %v169_v29  ;;  %v171_v32 = vpop.f32.mrb[3].mxu0 }
  0xf9   :  { %v206_v33 = vmax.f32 %v202_v28, 0.0  ;;  %v204_v34 = vadd.f32 %v198_v24, %v171_v32 }
  0xfa   :  { %v207_v35 = vmax.f32 %v203_v31, 0.0 }
  0xfb   :  { %v246_v36 = vpack.c.bf16 %v206_v33, %v205_v30  ;;  %v208_v37 = vmax.f32 %v204_v34, 0.0 }
  0xfd   :  { %221 = vst [vmem:[%s358_s3] sm:$0xff] %v246_v36  ;;  %v247_v38 = vpack.c.bf16 %v208_v37, %v207_v35 }
  0xff   :  { %222 = vst [vmem:[%s358_s3 + $0x8] sm:$0xff] %v247_v38 }

// kernel: decoder_layer_forward.5
= control target key start
LH: loop header
LB: loop body
LE: loop exit
PB: predicated region body
PF: predicated region fallthrough
CT: control target
= control target key end

     0   :  { %v687_v1 = vmov 0   ;;  %v688_v21 = vmov 0.0   ;;  %vm689_vm0 = vmmov 0   ;;  %v307_v29 = vlaneseq  ;;  %s691_s21 = smov 112   ;;  %s693_s22 = smov 16   ;;  %s971_s1 = inlined_call_operand.vmem [shape: bf16[128,384], index: 1, kind: input, shape index: {}]   ;;  %s972_s0 = inlined_call_operand.vmem [shape: f32[16,128], index: 0, kind: input, shape index: {}]   ;;  %s973_s2 = inlined_call_operand.vmem [shape: f32[1,384], index: 2, kind: input, shape index: {}]   ;;  %s974_s3 = inlined_call_operand.vmem [shape: f32[16,32], index: 3, kind: input, shape index: {}]   ;;  %s975_s4 = inlined_call_operand.vmem [shape: f32[16,32], index: 4, kind: input, shape index: {}]   ;;  %s976_s5 = inlined_call_operand.vmem [shape: bf16[16,384], index: 5, kind: output, shape index: {}]  }
   0x1   :  { %v655_v0 = vld [vmem:[%s971_s1 + $0x4] ss:$12 sps:$4 sm:$0xff]   ;;  %232 = vmatprep.mubr.bf16.mxu0 %v687_v1  ;;  %v657_v2 = vld [vmem:[%s971_s1] ss:$12 sps:$4 sm:$0xff]   ;;  %v658_v3 = vld [vmem:[%s971_s1 + $0x1c] ss:$12 sps:$4 sm:$0xff]   ;;  %625 = vmatprep.subr.bf16.mxu1 %v688_v21 }
   0x2   :  { %200 = vmatprep.subr.bf16.mxu0 %v655_v0  ;;  %v660_v4 = vld [vmem:[%s971_s1 + $0x18] ss:$12 sps:$4 sm:$0xff]   ;;  %v661_v5 = vld [vmem:[%s971_s1 + $0x34] ss:$12 sps:$4 sm:$0xff]   ;;  %v663_v6 = vld [vmem:[%s971_s1 + $0x30] ss:$12 sps:$4 sm:$0xff]   ;;  %641 = vmatprep.mubr.msk.bf16.mxu1 %vm689_vm0, %v688_v21 }
   0x3   :  { %201 = vmatpush1.bf16.msra.mxu0 %v657_v2  ;;  %v664_v7 = vld [vmem:[%s971_s1 + $0x4c] ss:$12 sps:$4 sm:$0xff]   ;;  %v666_v8 = vld [vmem:[%s971_s1 + $0x48] ss:$12 sps:$4 sm:$0xff]   ;;  %v667_v9 = vld [vmem:[%s971_s1 + $0x64] ss:$12 sps:$4 sm:$0xff]  }
   0x4   :  { %202 = vmatprep.subr.bf16.mxu0 %v658_v3  ;;  %v669_v10 = vld [vmem:[%s971_s1 + $0x60] ss:$12 sps:$4 sm:$0xff]   ;;  %v670_v11 = vld [vmem:[%s971_s1 + $0x7c] ss:$12 sps:$4 sm:$0xff]   ;;  %v672_v12 = vld [vmem:[%s971_s1 + $0x78] ss:$12 sps:$4 sm:$0xff]  }
   0x5   :  { %v673_v13 = vld [vmem:[%s971_s1 + $0x94] ss:$12 sps:$4 sm:$0xff]   ;;  %v675_v14 = vld [vmem:[%s971_s1 + $0x90] ss:$12 sps:$4 sm:$0xff]   ;;  %v676_v15 = vld [vmem:[%s971_s1 + $0xac] ss:$12 sps:$4 sm:$0xff]  }
   0x6   :  { %v678_v16 = vld [vmem:[%s971_s1 + $0xa8] ss:$12 sps:$4 sm:$0xff]   ;;  %v31_v17 = vld [vmem:[%s972_s0] sm:$0xff]  ;;  %v682_v24 = vld [vmem:[%s971_s1 + $0x50] ss:$12 sps:$4 sm:$0xff]   ;;  %v805_v30 = vshrl.u32 %v307_v29, 7 }
   0x7   :  { %203 = vmatpush1.bf16.msra.mxu0 %v660_v4  ;;  %v32_v18 = vld [vmem:[%s972_s0 + $0x8] sm:$0xff]  ;;  %v681_v23 = vld [vmem:[%s971_s1 + $0x38] ss:$12 sps:$4 sm:$0xff]   ;;  %v686_v28 = vld [vmem:[%s971_s1 + $0xb0] ss:$12 sps:$4 sm:$0xff]   ;;  %s694_s27 = smov 32  }
   0x8   :  { %204 = vmatprep.subr.bf16.mxu0 %v661_v5  ;;  %v65_v19 = vpack.c.bf16 %v32_v18, %v31_v17  ;;  %v679_v20 = vld [vmem:[%s971_s1 + $0x8] ss:$12 sps:$4 sm:$0xff]   ;;  %v680_v22 = vld [vmem:[%s971_s1 + $0x20] ss:$12 sps:$4 sm:$0xff]   ;;  %v685_v27 = vld [vmem:[%s971_s1 + $0x98] ss:$12 sps:$4 sm:$0xff]  }
   0x9   :  { %626 = vmatpush3.bf16.msra.mxu1 %v679_v20  ;;  %v683_v25 = vld [vmem:[%s971_s1 + $0x68] ss:$12 sps:$4 sm:$0xff]   ;;  %v684_v26 = vld [vmem:[%s971_s1 + $0x80] ss:$12 sps:$4 sm:$0xff]   ;;  %v309_v31 = vsub.s32 0, %v805_v30  ;;  %s690_s1 = smov 80  }
   0xa   :  { %627 = vmatprep.subr.bf16.mxu1 %v688_v21  ;;  %v811_v32 = vld [vmem:[%s973_s2] sm:$0x7]  ;;  %v313_v39 = vsub.s32 1, %v805_v30  ;;  %s692_s2 = smov 48   ;;  %v846_v45 = vld [vmem:[%s974_s3 + $0x8] sm:$0xff]  ;;  %s696_s28 = smov 96  }
   0xb   :  { %205 = vmatpush1.bf16.msra.mxu0 %v663_v6  ;;  %v310_v33 = vrot.slane %v811_v32, %v309_v31  ;;  %v841_v44 = vld [vmem:[%s974_s3] sm:$0xff]  ;;  %v333_v47 = vmul.f32 0.17677669, %v846_v45  ;;  %s695_s3 = smov 64   ;;  %vm350_vm1 = vcmask 130048   ;;  %vm439_vm2 = vcmask 261120  }
   0xc   :  { %206 = vmatprep.subr.bf16.mxu0 %v664_v7  ;;  %v314_v41 = vrot.slane %v811_v32, %v313_v39  ;;  %v332_v46 = vmul.f32 0.17677669, %v841_v44  ;;  %v873_v48 = vld [vmem:[%s975_s4] sm:$0xff]  ;;  %vm442_vm3 = vcmask 523264   ;;  %vm445_vm4 = vcmask 785408  }
   0xd   :  { %628 = vmatpush3.bf16.msra.mxu1 %v680_v22  ;;  %v334_v49 = vmul.f32 0.17677669, %v873_v48 }
   0xe   :  { %629 = vmatprep.subr.bf16.mxu1 %v688_v21 }
   0xf   :  { %207 = vmatpush1.bf16.msra.mxu0 %v666_v8 }
  0x10   :  { %208 = vmatprep.subr.bf16.mxu0 %v667_v9 }
  0x11   :  { %630 = vmatpush3.bf16.msra.mxu1 %v681_v23 }
  0x12   :  { %631 = vmatprep.subr.bf16.mxu1 %v688_v21 }
  0x13   :  { %209 = vmatpush1.bf16.msra.mxu0 %v669_v10  ;;  %v892_v10 = vld [vmem:[%s975_s4 + $0x8] sm:$0xff] }
  0x14   :  { %210 = vmatprep.subr.bf16.mxu0 %v670_v11 }
  0x15   :  { %632 = vmatpush3.bf16.msra.mxu1 %v682_v24 }
  0x16   :  { %633 = vmatprep.subr.bf16.mxu1 %v688_v21 }
  0x17   :  { %211 = vmatpush1.bf16.msra.mxu0 %v672_v12 }
  0x18   :  { %212 = vmatprep.subr.bf16.mxu0 %v673_v13  ;;  %v335_v13 = vmul.f32 0.17677669, %v892_v10 }
  0x19   :  { %634 = vmatpush3.bf16.msra.mxu1 %v683_v25 }
  0x1a   :  { %635 = vmatprep.subr.bf16.mxu1 %v688_v21 }
  0x1b   :  { %213 = vmatpush1.bf16.msra.mxu0 %v675_v14 }
  0x1c   :  { %214 = vmatprep.subr.bf16.mxu0 %v676_v15 }
  0x1d   :  { %636 = vmatpush3.bf16.msra.mxu1 %v684_v26 }
  0x1e   :  { %637 = vmatprep.subr.bf16.mxu1 %v688_v21 }
  0x1f   :  { %215 = vmatpush1.bf16.msra.mxu0 %v678_v16 }
  0x21   :  { %638 = vmatpush3.bf16.msra.mxu1 %v685_v27 }
  0x22   :  { %233 = vmatmul.mubr.bf16.vlgmr.msra.gmra.mrb[0].mxu0 %v65_v19  ;;  %639 = vmatprep.subr.bf16.mxu1 %v688_v21 }
  0x25   :  { %640 = vmatpush3.bf16.msra.mxu1 %v686_v28 }
  0x28   :  { %642 = vmatmul.mubr.bf16.vlgmr.msra.gmra.mrb[0].mxu1 %v65_v19 }
  0xf5   :  { %v234_v34 = vpop.f32.mrb[0].mxu0 }
  0xf6   :  { %v814_v35 = vadd.f32 %v310_v33, %v234_v34  ;;  %v236_v36 = vpop.f32.mrb[1].mxu0  ;;  %v317_v34 = vsub.s32 2, %v805_v30 }
  0xf7   :  { %v238_v37 = vpop.f32.mrb[2].mxu0  ;;  %v826_v42 = vadd.f32 %v314_v41, %v236_v36 }
  0xf8   :  { %359 = vrot.lane.b32.xlu1 %v814_v35, %s690_s1  ;;  %338 = vrot.lane.b32.xlu0 %v814_v35, %s691_s21  ;;  %v240_v38 = vpop.f32.mrb[3].mxu0  ;;  %v819_v40 = vadd.f32 %v310_v33, %v238_v37  ;;  %v353_v62 = vmul.f32 %v332_v46, %v814_v35  ;;  %v318_v37 = vrot.slane %v811_v32, %v317_v34 }
  0xf9   :  { %v830_v43 = vadd.f32 %v314_v41, %v240_v38 }
  0xfa   :  { %v354_v18 = vmul.f32 %v333_v47, %v819_v40 }
  0xfb   :  { %v277_v31 = vpop.f32.mrb[0].mxu1 }
  0xfc   :  { %389 = vrot.lane.b32.xlu0 %v814_v35, %s692_s2  ;;  %361 = vrot.lane.b32.xlu1 %v819_v40, %s690_s1  ;;  %v643_v36 = vpop.f32.mrb[1].mxu1 }
  0xfd   :  { %v280_v38 = vpop.f32.mrb[2].mxu1 }
  0xfe   :  { %v644_v41 = vpop.f32.mrb[3].mxu1 }
 0x100   :  { %344 = vrot.lane.b32.xlu0 %v814_v35, %s693_s22  ;;  %391 = vrot.lane.b32.xlu1 %v819_v40, %s692_s2 }
 0x104   :  { %450 = vrot.lane.b32.xlu0 %v826_v42, %s691_s21  ;;  %346 = vrot.lane.b32.xlu1 %v819_v40, %s693_s22 }
 0x108   :  { %470 = vrot.lane.b32.xlu0 %v826_v42, %s690_s1  ;;  %452 = vrot.lane.b32.xlu1 %v830_v43, %s691_s21 }
 0x10c   :  { %500 = vrot.lane.b32.xlu0 %v826_v42, %s692_s2  ;;  %472 = vrot.lane.b32.xlu1 %v830_v43, %s690_s1 }
 0x110   :  { %340 = vrot.lane.b32.xlu0 %v819_v40, %s691_s21  ;;  %502 = vrot.lane.b32.xlu1 %v830_v43, %s692_s2 }
 0x114   :  { %456 = vrot.lane.b32.xlu0 %v826_v42, %s693_s22  ;;  %458 = vrot.lane.b32.xlu1 %v830_v43, %s693_s22 }
 0x118   :  { %369 = vrot.lane.b32.xlu0 %v332_v46, %s694_s27  ;;  %371 = vrot.lane.b32.xlu1 %v333_v47, %s694_s27 }
 0x11c   :  { %480 = vrot.lane.b32.xlu0 %v841_v44, %s694_s27  ;;  %482 = vrot.lane.b32.xlu1 %v846_v45, %s694_s27 }
 0x120   :  { %397 = vrot.lane.b32.xlu0 %v332_v46, %s695_s3  ;;  %399 = vrot.lane.b32.xlu1 %v333_v47, %s695_s3 }
 0x124   :  { %508 = vrot.lane.b32.xlu0 %v841_v44, %s695_s3  ;;  %510 = vrot.lane.b32.xlu1 %v846_v45, %s695_s3 }
 0x128   :  { %419 = vrot.lane.b32.xlu0 %v332_v46, %s696_s28  ;;  %421 = vrot.lane.b32.xlu1 %v333_v47, %s696_s28  ;;  %v324_v47 = vadd.f32 %v318_v37, %v277_v31 }
 0x12c   :  { %530 = vrot.lane.b32.xlu0 %v841_v44, %s696_s28  ;;  %532 = vrot.lane.b32.xlu1 %v846_v45, %s696_s28 }
 0x16a   :  { %v360_v50 = vpop.permute.xlu1 %359  ;;  %v339_v51 = vpop.permute.xlu0 %338 }
 0x16b   :  { %v365_v52 = vsel %vm350_vm1, %v360_v50, %v339_v51 }
 0x16c   :  { %v377_v53 = vmul.f32 %v365_v52, %v334_v49 }
 0x16e   :  { %v390_v54 = vpop.permute.xlu0 %389  ;;  %v362_v55 = vpop.permute.xlu1 %361  ;;  %381 = vrot.lane.b32.xlu0 %v377_v53, %s694_s27 }
 0x16f   :  { %v395_v56 = vsel %vm350_vm1, %v390_v54, %v360_v50  ;;  %v613_v50 = vpack.c.bf16 %v324_v47, %v324_v47 }
 0x170   :  { %v405_v57 = vmul.f32 %v395_v56, %v334_v49 }
 0x171   :  { %577 = vst [vmem:[%s976_s5 + $0x8] sm:$0xf] %v613_v50 }
 0x172   :  { %v345_v58 = vpop.permute.xlu0 %344  ;;  %v392_v59 = vpop.permute.xlu1 %391  ;;  %409 = vrot.lane.b32.xlu0 %v405_v57, %s695_s3 }
 0x173   :  { %v351_v60 = vsel %vm350_vm1, %v339_v51, %v345_v58  ;;  %v417_v61 = vsel %vm350_vm1, %v345_v58, %v390_v54  ;;  %v396_v21 = vsel %vm350_vm1, %v392_v59, %v362_v55 }
 0x174   :  { %v355_v63 = vmul.f32 %v351_v60, %v334_v49  ;;  %v427_v0 = vmul.f32 %v417_v61, %v334_v49  ;;  %v406_v28 = vmul.f32 %v396_v21, %v335_v13  ;;  %v327_v49 = vadd.f32 %v318_v37, %v280_v38 }
 0x176   :  { %v883_v1 = vadd.f32 %v355_v63, %v353_v62  ;;  %v451_v2 = vpop.permute.xlu0 %450  ;;  %v347_v3 = vpop.permute.xlu1 %346  ;;  %431 = vrot.lane.b32.xlu0 %v427_v0, %s696_s28  ;;  %v615_v51 = vpack.c.bf16 %v327_v49, %v327_v49  ;;  %v465_v49 = vmul.f32 %v846_v45, %v830_v43 }
 0x177   :  { %v418_v33 = vsel %vm350_vm1, %v347_v3, %v392_v59 }
 0x178   :  { %v428_v39 = vmul.f32 %v418_v33, %v335_v13  ;;  %579 = vst [vmem:[%s976_s5 + $0x14] sm:$0xf] %v615_v51 }
 0x17a   :  { %v471_v4 = vpop.permute.xlu0 %470  ;;  %v453_v5 = vpop.permute.xlu1 %452 }
 0x17b   :  { %v476_v6 = vsel %vm350_vm1, %v471_v4, %v451_v2 }
 0x17c   :  { %v488_v7 = vmul.f32 %v476_v6, %v873_v48 }
 0x17e   :  { %v501_v8 = vpop.permute.xlu0 %500  ;;  %492 = vrot.lane.b32.xlu0 %v488_v7, %s694_s27  ;;  %v473_v9 = vpop.permute.xlu1 %472 }
 0x17f   :  { %v506_v11 = vsel %vm350_vm1, %v501_v8, %v471_v4  ;;  %v477_v46 = vsel %vm350_vm1, %v473_v9, %v453_v5 }
 0x180   :  { %v516_v12 = vmul.f32 %v506_v11, %v873_v48  ;;  %v489_v30 = vmul.f32 %v477_v46, %v892_v10 }
 0x182   :  { %520 = vrot.lane.b32.xlu0 %v516_v12, %s695_s3  ;;  %v341_v14 = vpop.permute.xlu0 %340  ;;  %v503_v15 = vpop.permute.xlu1 %502 }
 0x183   :  { %v352_v16 = vsel %vm350_vm1, %v341_v14, %v347_v3  ;;  %v366_v17 = vsel %vm350_vm1, %v362_v55, %v341_v14  ;;  %v507_v52 = vsel %vm350_vm1, %v503_v15, %v473_v9 }
 0x184   :  { %v356_v19 = vmul.f32 %v352_v16, %v335_v13  ;;  %v378_v20 = vmul.f32 %v366_v17, %v335_v13  ;;  %v517_v32 = vmul.f32 %v507_v52, %v892_v10  ;;  %v464_v16 = vmul.f32 %v841_v44, %v826_v42 }
 0x186   :  { %v902_v22 = vadd.f32 %v356_v19, %v354_v18  ;;  %v457_v23 = vpop.permute.xlu0 %456  ;;  %383 = vrot.lane.b32.xlu1 %v378_v20, %s694_s27  ;;  %v459_v24 = vpop.permute.xlu1 %458 }
 0x187   :  { %v462_v25 = vsel %vm350_vm1, %v451_v2, %v457_v23  ;;  %v528_v26 = vsel %vm350_vm1, %v457_v23, %v501_v8  ;;  %v908_v27 = vsel %vm350_vm1, %v453_v5, %v459_v24  ;;  %v529_v53 = vsel %vm350_vm1, %v459_v24, %v503_v15 }
 0x188   :  { %v538_v29 = vmul.f32 %v528_v26, %v873_v48  ;;  %v539_v54 = vmul.f32 %v529_v53, %v892_v10  ;;  %v466_v8 = vmul.f32 %v462_v25, %v873_v48 }
 0x18a   :  { %542 = vrot.lane.b32.xlu0 %v538_v29, %s696_s28  ;;  %411 = vrot.lane.b32.xlu1 %v406_v28, %s695_s3  ;;  %v370_v55 = vpop.permute.xlu0 %369  ;;  %v372_v59 = vpop.permute.xlu1 %371  ;;  %v468_v21 = vadd.f32 %v466_v8, %v464_v16 }
 0x18b   :  { %v375_v9 = vmul.f32 %v370_v55, %v814_v35  ;;  %v376_v38 = vmul.f32 %v372_v59, %v819_v40 }
 0x18e   :  { %433 = vrot.lane.b32.xlu1 %v428_v39, %s696_s28  ;;  %v481_v56 = vpop.permute.xlu0 %480  ;;  %v483_v61 = vpop.permute.xlu1 %482 }
 0x18f   :  { %v486_v11 = vmul.f32 %v481_v56, %v826_v42  ;;  %v487_v39 = vmul.f32 %v483_v61, %v830_v43 }
 0x192   :  { %494 = vrot.lane.b32.xlu1 %v489_v30, %s694_s27  ;;  %v398_v57 = vpop.permute.xlu0 %397  ;;  %v400_v0 = vpop.permute.xlu1 %399 }
 0x193   :  { %v403_v13 = vmul.f32 %v398_v57, %v814_v35  ;;  %v404_v41 = vmul.f32 %v400_v0, %v819_v40 }
 0x196   :  { %522 = vrot.lane.b32.xlu1 %v517_v32, %s695_s3  ;;  %v509_v58 = vpop.permute.xlu0 %508  ;;  %v511_v3 = vpop.permute.xlu1 %510 }
 0x197   :  { %v514_v14 = vmul.f32 %v509_v58, %v826_v42  ;;  %v515_v46 = vmul.f32 %v511_v3, %v830_v43 }
 0x19a   :  { %544 = vrot.lane.b32.xlu1 %v539_v54, %s696_s28  ;;  %v420_v60 = vpop.permute.xlu0 %419  ;;  %v422_v5 = vpop.permute.xlu1 %421 }
 0x19b   :  { %v425_v17 = vmul.f32 %v420_v60, %v814_v35  ;;  %v426_v50 = vmul.f32 %v422_v5, %v819_v40 }
 0x19e   :  { %v531_v62 = vpop.permute.xlu0 %530  ;;  %v533_v7 = vpop.permute.xlu1 %532 }
 0x19f   :  { %v536_v23 = vmul.f32 %v531_v62, %v826_v42 }
 0x1e0   :  { %v382_v63 = vpop.permute.xlu0 %381 }
 0x1e1   :  { %v387_v18 = vadd.f32 %v382_v63, %v375_v9 }
 0x1e3   :  { %v440_v28 = vsel %vm439_vm2, %v883_v1, %v387_v18  ;;  %v467_v1 = vmul.f32 %v908_v27, %v892_v10  ;;  %v537_v10 = vmul.f32 %v533_v7, %v830_v43 }
 0x1e4   :  { %v410_v2 = vpop.permute.xlu0 %409 }
 0x1e5   :  { %v415_v20 = vadd.f32 %v410_v2, %v403_v13  ;;  %v469_v53 = vadd.f32 %v467_v1, %v465_v49 }
 0x1e7   :  { %v443_v35 = vsel %vm442_vm3, %v440_v28, %v415_v20 }
 0x1e8   :  { %v432_v4 = vpop.permute.xlu0 %431 }
 0x1e9   :  { %v437_v24 = vadd.f32 %v432_v4, %v425_v17 }
 0x1eb   :  { %v446_v33 = vsel %vm445_vm4, %v443_v35, %v437_v24 }
 0x1f0   :  { %v493_v6 = vpop.permute.xlu0 %492 }
 0x1f1   :  { %v498_v19 = vadd.f32 %v493_v6, %v486_v11 }
 0x1f3   :  { %v550_v44 = vsel %vm439_vm2, %v468_v21, %v498_v19 }
 0x1f4   :  { %v521_v12 = vpop.permute.xlu0 %520 }
 0x1f5   :  { %v526_v48 = vadd.f32 %v521_v12, %v514_v14 }
 0x1f7   :  { %v552_v31 = vsel %vm442_vm3, %v550_v44, %v526_v48 }
 0x1f8   :  { %v384_v15 = vpop.permute.xlu1 %383 }
 0x1f9   :  { %v388_v51 = vadd.f32 %v384_v15, %v376_v38 }
 0x1fb   :  { %v441_v55 = vsel %vm439_vm2, %v902_v22, %v388_v51 }
 0x1fc   :  { %v543_v25 = vpop.permute.xlu0 %542  ;;  %v412_v26 = vpop.permute.xlu1 %411 }
 0x1fd   :  { %v548_v29 = vadd.f32 %v543_v25, %v536_v23  ;;  %v416_v52 = vadd.f32 %v412_v26, %v404_v41 }
 0x1ff   :  { %v554_v34 = vsel %vm445_vm4, %v552_v31, %v548_v29  ;;  %v444_v58 = vsel %vm442_vm3, %v441_v55, %v416_v52 }
 0x200   :  { %v612_v42 = vpack.c.bf16 %v554_v34, %v446_v33  ;;  %v434_v36 = vpop.permute.xlu1 %433 }
 0x201   :  { %v438_v27 = vadd.f32 %v434_v36, %v426_v50 }
 0x202   :  { %576 = vst [vmem:[%s976_s5] sm:$0xff] %v612_v42 }
 0x203   :  { %v447_v40 = vsel %vm445_vm4, %v444_v58, %v438_v27 }
 0x204   :  { %v495_v37 = vpop.permute.xlu1 %494 }
 0x205   :  { %v499_v30 = vadd.f32 %v495_v37, %v487_v39 }
 0x207   :  { %v551_v56 = vsel %vm439_vm2, %v469_v53, %v499_v30 }
 0x208   :  { %v523_v47 = vpop.permute.xlu1 %522 }
 0x209   :  { %v527_v32 = vadd.f32 %v523_v47, %v515_v46 }
 0x20b   :  { %v553_v45 = vsel %vm442_vm3, %v551_v56, %v527_v32 }
 0x20c   :  { %v545_v54 = vpop.permute.xlu1 %544 }
 0x20d   :  { %v549_v57 = vadd.f32 %v545_v54, %v537_v10 }
 0x20f   :  { %v555_v59 = vsel %vm445_vm4, %v553_v45, %v549_v57 }
 0x210   :  { %v614_v60 = vpack.c.bf16 %v555_v59, %v447_v40 }
 0x212   :  { %578 = vst [vmem:[%s976_s5 + $0xc] sm:$0xff] %v614_v60 }

// kernel: decoder_layer_forward.6
= control target key start
LH: loop header
LB: loop body
LE: loop exit
PB: predicated region body
PF: predicated region fallthrough
CT: control target
= control target key end

     0   :  { %s1331_s15 = smov 0   ;;  %s1333_s16 = smov 0   ;;  %s1513_s0 = inlined_call_operand.vmem [shape: bf16[2,8,384], index: 0, kind: input, shape index: {}, may-alias: {0,1,2}]   ;;  %s1514_s1 = inlined_call_operand.vmem [shape: bf16[2,8,384], index: 1, kind: input, shape index: {}, may-alias: {0,1,2}]   ;;  %s1515_s2 = inlined_call_operand.vmem [shape: bf16[2,8,384], index: 2, kind: input, shape index: {}, may-alias: {0,1,2}]   ;;  %s1516_s3 = inlined_call_operand.vmem [shape: s32[2,1,8], index: 3, kind: input, shape index: {}]   ;;  %s1517_s4 = inlined_call_operand.vmem [shape: bf16[2,8,128], index: 4, kind: output, shape index: {}]  }
   0x1   :  { %s1335_s17 = smov 0  }
   0x2 LB: > { %s33_s18 = sadd.s32 1, %s1293_s16  ;;  %p1131_p0 = scmp.ge.s32.totalorder %s1297_s17, 1  ;;  %s1297_s17 = sphi %s1335_s17, %s14_s17   ;;  %s1293_s16 = sphi %s1333_s16, %s1521_s16   ;;  %s1289_s15 = sphi %s1331_s15, %s1520_s15  }
   0x3   : > { %p35_p1 = scmp.ge.s32.totalorder %s33_s18, 2  ;;  %p236_p2 = scmp.lt.s32.totalorder %s1297_s17, 3 }
   0x5   : > { %s1523_s18 = smov (%p35_p1, %s33_s18), 0  ;;  %p237_p3 = pnand %p1131_p0, %p236_p2 }
   0x6   : > { %p294_p4 = scmp.lt.s32.totalorder (!%p237_p3), %s1289_s15, 1  ;;  %vm350_vm0 = vcmask (!%p237_p3), 261120   ;;  %v1299_v0 = vmov (!%p237_p3), 0.0   ;;  %vm1300_vm1 = vmmov (!%p237_p3), 0   ;;  %v1301_v1 = vmov (!%p237_p3), 0   ;;  %s1303_s29 = smov (!%p237_p3), 96  }
   0x7   : > { %240 = sbr.rel (%p237_p3) target bundleno = 1468 (0x5bc), region = 36  ;;  %1167 = vmatprep.subr.bf16.mxu0 (!%p237_p3), %v1299_v0  ;;  %351 = vst.msk [vmem:[#allocation4] sm:$0xff] (!%p237_p3), %vm350_vm0, %v1299_v0  ;;  %352 = vst.msk [vmem:[#allocation4 + $0x8] sm:$0xff] (!%p237_p3), %vm350_vm0, %v1299_v0  ;;  %1169 = vmatprep.mubr.msk.bf16.mxu0 (!%p237_p3), %vm1300_vm1, %v1299_v0  ;;  %vm341_vm2 = vcmask (!%p237_p3), 7168   ;;  %v1302_v5 = vmov (!%p237_p3), -inf   ;;  %v359_v6 = vlaneseq (!%p237_p3)  ;;  %vm427_vm7 = vcmask (!%p237_p3), 64512  }
   0x8   : > { %353 = vst.msk [vmem:[#allocation4 + $0x10] sm:$0xff] (!%p237_p3), %vm350_vm0, %v1299_v0  ;;  %354 = vst.msk [vmem:[#allocation4 + $0x18] sm:$0xff] (!%p237_p3), %vm350_vm0, %v1299_v0  ;;  %1247 = vset.pattern.permute.xlu0 (!%p237_p3), %v1301_v1  ;;  %1173 = vmatprep.subr.bf16.mxu1 (!%p237_p3), %v1299_v0  ;;  %s1304_s30 = smov (!%p237_p3), 64   ;;  %s1305_s5 = smov (!%p237_p3), 32   ;;  %vm455_vm8 = vcmask (!%p237_p3), 1043456   ;;  %vm978_vm9 = vcmask (!%p237_p3), 523264  }
   0x9   : > { %1175 = vmatprep.mubr.msk.bf16.mxu1 (!%p237_p3), %vm1300_vm1, %v1299_v0  ;;  %1248 = vset.pattern.permute.xlu1 (!%p237_p3), %v1301_v1  ;;  %342 = vst.msk [vmem:[#allocation2] sm:$0xff] (!%p237_p3), %vm341_vm2, %v1302_v5  ;;  %343 = vst.msk [vmem:[#allocation2 + $0x8] sm:$0xff] (!%p237_p3), %vm341_vm2, %v1302_v5  ;;  %v360_v8 = vshrl.u32 (!%p237_p3), %v359_v6, 7  ;;  %v365_v11 = vand.u32 (!%p237_p3), 127, %v359_v6  ;;  %vm980_vm10 = vcmask (!%p237_p3), 785408  }
   0xa   : > { %344 = vst.msk [vmem:[#allocation2 + $0x10] sm:$0xff] (!%p237_p3), %vm341_vm2, %v1302_v5  ;;  %345 = vst.msk [vmem:[#allocation2 + $0x18] sm:$0xff] (!%p237_p3), %vm341_vm2, %v1302_v5 }
   0xb   : > { %346 = vst.msk [vmem:[#allocation3] sm:$0xff] (!%p237_p3), %vm341_vm2, %v1299_v0  ;;  %347 = vst.msk [vmem:[#allocation3 + $0x8] sm:$0xff] (!%p237_p3), %vm341_vm2, %v1299_v0  ;;  %v374_v9 = vsub.s32 (!%p237_p3), 0, %v360_v8  ;;  %vm368_vm4 = vcmp.le.s32.totalorder (!%p237_p3), %v365_v11, %v360_v8 }
   0xc   : > { %348 = vst.msk [vmem:[#allocation3 + $0x10] sm:$0xff] (!%p237_p3), %vm341_vm2, %v1299_v0  ;;  %349 = vst.msk [vmem:[#allocation3 + $0x18] sm:$0xff] (!%p237_p3), %vm341_vm2, %v1299_v0 }
   0xe   : > { %s1525_s15 = smov (!%p294_p4, %s1289_s15), 1 }
   0xf   : > { %s1366_s19 = smul.u32 12, %s1525_s15  ;;  %s328_s28 = scalar_lea.vmem %s1516_s3, %s1525_s15 }
  0x10   : > { %v369_v7 = vld [vmem:[%s328_s28] sm:$0x1]  ;;  %s1135_s9 = sshll.u32 %s1525_s15, 2 }
  0x11   : > { %s1059_s22 = scalar_lea.vmem %s1514_s1, %s1366_s19  ;;  %s302_s25 = scalar_lea.vmem %s1513_s0, %s1366_s19  ;;  %vm370_vm3 = vcmp.gt.s32.totalorder %v369_v7, 0  ;;  %v1410_v22 = vld [vmem:[#allocation2] sm:$0xff]  ;;  %v706_v5 = vld [vmem:[#allocation2 + $0x10] sm:$0xff] }
  0x12   : > { %v1136_v2 = vld [vmem:[%s1059_s22 + $0x4] sm:$0xf]  ;;  %v355_v4 = vld [vmem:[%s302_s25] sm:$0xf]  ;;  %v371_v10 = vsel %vm370_vm3, 1, %v1301_v1  ;;  %s1065_s8 = scalar_lea.vmem %s1515_s2, %s1366_s19  ;;  %v567_v1 = vld [vmem:[#allocation2 + $0x8] sm:$0xff]  ;;  %s335_s12 = scalar_lea.vmem %s1517_s4, %s1135_s9 }
  0x13   : > { %v383_v3 = vsel %vm350_vm0, %v1136_v2, 0  ;;  %v375_v12 = vrot.slane %v371_v10, %v374_v9  ;;  %v1141_v20 = vcombine.low %v1136_v2, %v1136_v2  ;;  %v1140_v21 = vcombine.low %v355_v4, %v355_v4  ;;  %v1424_v26 = vld [vmem:[%s1065_s8 + $0x8] sm:$0xf]  ;;  %v842_v9 = vld [vmem:[#allocation2 + $0x18] sm:$0xff] }
  0x14   : > { %1168 = vmatpush3.bf16.xpose.msra.mxu0 %v383_v3  ;;  %v457_v27 = vsel %vm455_vm8, %v1424_v26, 0 }
  0x15   : > { %1185 = vmatprep.subr.bf16.mxu0 %v1299_v0  ;;  %vm376_vm5 = vcmp.eq.s32.totalorder %v375_v12, 1  ;;  %517 = vrot.lane.b32.xlu1 %v1141_v20, %s1303_s29  ;;  %v1143_v12 = vcombine.low %v1424_v26, %v1424_v26 }
  0x16   : > { %vm1397_vm6 = vmand %vm368_vm4, %vm376_vm5  ;;  %1174 = vmatpush3.bf16.msra.mxu1 %v457_v27 }
  0x17   : > { %1179 = vmatprep.subr.bf16.mxu1 %v1299_v0 }
  0x19   : > { %512 = vrot.lane.b32.xlu1 %v1140_v21, %s1303_s29 }
  0x1b   : > { %1170 = vmatmul.mubr.msk.bf16.vlgmr.msra.gmra.mrb[0].mxu0 %vm350_vm0, %v355_v4 }
  0x1c   : > { %1187 = vmatprep.mubr.msk.bf16.mxu0 %vm1300_vm1, %v1299_v0 }
  0x1d   : > { %656 = vrot.lane.b32.xlu1 %v1141_v20, %s1304_s30 }
  0x21   : > { %654 = vrot.lane.b32.xlu1 %v1140_v21, %s1304_s30 }
  0x25   : > { %792 = vrot.lane.b32.xlu1 %v1141_v20, %s1305_s5 }
  0x29   : > { %790 = vrot.lane.b32.xlu1 %v1140_v21, %s1305_s5 }
  0x87   : > { %v518_v31 = vpop.permute.xlu1 %517 }
  0x88   : > { %v523_v34 = vsel %vm350_vm0, %v518_v31, 0 }
  0x8b   : > { %v513_v32 = vpop.permute.xlu1 %512 }
  0x8f   : > { %v657_v36 = vpop.permute.xlu1 %656 }
  0x90   : > { %v662_v38 = vsel %vm350_vm0, %v657_v36, 0 }
  0x93   : > { %v655_v37 = vpop.permute.xlu1 %654 }
  0x97   : > { %v793_v39 = vpop.permute.xlu1 %792 }
  0x98   : > { %v798_v40 = vsel %vm350_vm0, %v793_v39, 0 }
  0x9b   : > { %v791_v41 = vpop.permute.xlu1 %790 }
  0xee   : > { %v419_v14 = vpop.f32.mrb[0].mxu0 }
  0xef   : > { %v425_v15 = vsel %vm1397_vm6, %v419_v14, -1e+09  ;;  %v1171_v16 = vpop.f32.mrb[1].mxu0 }
  0xf0   : > { %v422_v17 = vpop.f32.mrb[2].mxu0  ;;  %v428_v18 = vsel %vm427_vm7, %v425_v15, -inf }
  0xf1   : > { %429 = vmax.xlane.f32.xlu0 %v428_v18  ;;  %v1172_v19 = vpop.f32.mrb[3].mxu0 }
 0x17e   : > { %v430_v23 = vpop.xlane.xlu0 %429 }
 0x17f   : > { %v1413_v24 = vmax.f32 %v1410_v22, %v430_v23 }
 0x181   : > { %v432_v25 = vsub.f32 %v1410_v22, %v1413_v24  ;;  %508 = vst.msk [vmem:[#allocation2] sm:$0xff] %vm341_vm2, %v1413_v24  ;;  %437 = vperm.xlu0 %1247, %v1413_v24  }
 0x200   : > { %v438_v28 = vpop.permute.xlu0 %437 }
 0x201   : > { %v440_v29 = vsub.f32 %v425_v15, %v438_v28 }
 0x203   : > { %v441_v30 = vmul.f32 1.442695, %v440_v29 }
 0x205   : > { %1251 = vpow2.f32 %v441_v30 }
 0x20f   : > { %v1429_v33 = vpop.eup %1251 }
 0x210   : > { %v451_v35 = vpack.c.bf16 %v1429_v33, %v1429_v33  ;;  %v445_v29 = vsel %vm427_vm7, %v1429_v33, 0.0 }
 0x212   : > { %1176 = vmatmul.mubr.msk.bf16.vlgmr.msra.gmra.mrb[0].mxu1 %vm427_vm7, %v451_v35 }
 0x213   : > { %1180 = vmatpush3.bf16.xpose.msra.mxu1 %v523_v34  ;;  %1181 = vmatprep.mubr.msk.bf16.mxu1 %vm1300_vm1, %v1299_v0 }
 0x214   : > { %1191 = vmatprep.subr.bf16.mxu1 %v1299_v0 }
 0x21a   : > { %1182 = vmatmul.mubr.msk.bf16.vlgmr.msra.gmra.mrb[4].mxu1 %vm350_vm0, %v513_v32 }
 0x21b   : > { %1192 = vmatpush3.bf16.xpose.msra.mxu1 %v662_v38  ;;  %1193 = vmatprep.mubr.msk.bf16.mxu1 %vm1300_vm1, %v1299_v0 }
 0x21c   : > { %1203 = vmatprep.subr.bf16.mxu1 %v1299_v0 }
 0x222   : > { %1194 = vmatmul.mubr.msk.bf16.vlgmr.msra.gmra.mrb[8].mxu1 %vm350_vm0, %v655_v37 }
 0x223   : > { %1204 = vmatpush3.bf16.xpose.msra.mxu1 %v798_v40  ;;  %1205 = vmatprep.mubr.msk.bf16.mxu1 %vm1300_vm1, %v1299_v0 }
 0x22a   : > { %1206 = vmatmul.mubr.msk.bf16.vlgmr.msra.gmra.mrb[12].mxu1 %vm350_vm0, %v791_v41 }
 0x2e5   : > { %v1448_v42 = vpop.f32.mrb[0].mxu1 }
 0x2e6   : > { %v1177_v43 = vpop.f32.mrb[1].mxu1 }
 0x2e7   : > { %v496_v44 = vpop.f32.mrb[2].mxu1 }
 0x2e8   : > { %v1178_v45 = vpop.f32.mrb[3].mxu1 }
 0x2ed   : > { %v559_v46 = vpop.f32.mrb[4].mxu1 }
 0x2ee   : > { %v565_v47 = vsel %vm1397_vm6, %v559_v46, -1e+09  ;;  %v1183_v48 = vpop.f32.mrb[5].mxu1  ;;  %v433_v46 = vmul.f32 1.442695, %v432_v25  ;;  %v723_v25 = vld [vmem:[#allocation3 + $0x10] sm:$0xff] }
 0x2ef   : > { %v562_v49 = vpop.f32.mrb[6].mxu1  ;;  %v568_v50 = vsel %vm427_vm7, %v565_v47, -inf }
 0x2f0   : > { %569 = vmax.xlane.f32.xlu1 %v568_v50  ;;  %v1184_v51 = vpop.f32.mrb[7].mxu1 }
 0x2f1   : > { %v584_v51 = vld [vmem:[#allocation3 + $0x8] sm:$0xff] }
 0x2f5   : > { %v698_v52 = vpop.f32.mrb[8].mxu1 }
 0x2f6   : > { %v704_v53 = vsel %vm1397_vm6, %v698_v52, -1e+09  ;;  %v1195_v54 = vpop.f32.mrb[9].mxu1 }
 0x2f7   : > { %v701_v55 = vpop.f32.mrb[10].mxu1  ;;  %v707_v56 = vsel %vm427_vm7, %v704_v53, -inf }
 0x2f8   : > { %708 = vmax.xlane.f32.xlu0 %v707_v56  ;;  %v1196_v57 = vpop.f32.mrb[11].mxu1 }
 0x2fd   : > { %v834_v58 = vpop.f32.mrb[12].mxu1 }
 0x2fe   : > { %v840_v59 = vsel %vm1397_vm6, %v834_v58, -1e+09  ;;  %v1207_v60 = vpop.f32.mrb[13].mxu1 }
 0x2ff   : > { %v837_v61 = vpop.f32.mrb[14].mxu1  ;;  %v843_v62 = vsel %vm427_vm7, %v840_v59, -inf  ;;  %v859_v60 = vld [vmem:[#allocation3 + $0x18] sm:$0xff] }
 0x300   : > { %844 = vmax.xlane.f32.xlu1 %v843_v62  ;;  %v1208_v63 = vpop.f32.mrb[15].mxu1 }
 0x37d   : > { %v570_v2 = vpop.xlane.xlu1 %569 }
 0x37e   : > { %v571_v3 = vmax.f32 %v567_v1, %v570_v2 }
 0x380   : > { %v572_v4 = vsub.f32 %v567_v1, %v571_v3  ;;  %653 = vst.msk [vmem:[#allocation2 + $0x8] sm:$0xff] %vm341_vm2, %v571_v3  ;;  %577 = vperm.xlu1 %1248, %v571_v3  }
 0x382   : > { %v573_v32 = vmul.f32 1.442695, %v572_v4  ;;  %v499_v4 = vld [vmem:[#allocation4] sm:$0xff] }
 0x385   : > { %v709_v6 = vpop.xlane.xlu0 %708 }
 0x386   : > { %v710_v7 = vmax.f32 %v706_v5, %v709_v6 }
 0x388   : > { %v711_v8 = vsub.f32 %v706_v5, %v710_v7  ;;  %789 = vst.msk [vmem:[#allocation2 + $0x10] sm:$0xff] %vm341_vm2, %v710_v7  ;;  %716 = vperm.xlu0 %1247, %v710_v7  }
 0x38a   : > { %v712_v33 = vmul.f32 1.442695, %v711_v8 }
 0x38d   : > { %v845_v10 = vpop.xlane.xlu1 %844 }
 0x38e   : > { %v846_v11 = vmax.f32 %v842_v9, %v845_v10 }
 0x390   : > { %v847_v13 = vsub.f32 %v842_v9, %v846_v11  ;;  %925 = vst.msk [vmem:[#allocation2 + $0x18] sm:$0xff] %vm341_vm2, %v846_v11  ;;  %852 = vperm.xlu1 %1248, %v846_v11  }
 0x392   : > { %v848_v48 = vmul.f32 1.442695, %v847_v13 }
 0x394   : > { %595 = vrot.lane.b32.xlu1 %v1143_v12, %s1303_s29 }
 0x398   : > { %731 = vrot.lane.b32.xlu1 %v1143_v12, %s1304_s30 }
 0x39c   : > { %867 = vrot.lane.b32.xlu1 %v1143_v12, %s1305_s5  ;;  %v644_v12 = vld [vmem:[#allocation4 + $0x8] sm:$0xff] }
 0x3ff   : > { %v578_v14 = vpop.permute.xlu1 %577 }
 0x400   : > { %v580_v15 = vsub.f32 %v565_v47, %v578_v14 }
 0x402   : > { %v581_v16 = vmul.f32 1.442695, %v580_v15 }
 0x404   : > { %1253 = vpow2.f32 %v581_v16 }
 0x407   : > { %v717_v17 = vpop.permute.xlu0 %716 }
 0x408   : > { %v719_v18 = vsub.f32 %v704_v53, %v717_v17  ;;  %v443_v53 = vld [vmem:[#allocation3] sm:$0xff] }
 0x40a   : > { %v720_v19 = vmul.f32 1.442695, %v719_v18 }
 0x40c   : > { %1255 = vpow2.f32 %v720_v19 }
 0x40e   : > { %v1254_v20 = vpop.eup %1253 }
 0x40f   : > { %v853_v21 = vpop.permute.xlu1 %852  ;;  %v586_v23 = vsel %vm427_vm7, %v1254_v20, 0.0  ;;  %v591_v34 = vpack.c.bf16 %v1254_v20, %v1254_v20  ;;  %v780_v20 = vld [vmem:[#allocation4 + $0x10] sm:$0xff] }
 0x410   : > { %v855_v26 = vsub.f32 %v840_v59, %v853_v21  ;;  %587 = vadd.xlane.f32.xlu1 %v586_v23 }
 0x412   : > { %v856_v27 = vmul.f32 1.442695, %v855_v26 }
 0x413   : > { %v596_v28 = vpop.permute.xlu1 %595 }
 0x414   : > { %1257 = vpow2.f32 %v856_v27  ;;  %v601_v30 = vsel %vm455_vm8, %v596_v28, 0  ;;  %446 = vadd.xlane.f32.xlu1 %v445_v29 }
 0x415   : > { %1186 = vmatpush3.bf16.msra.mxu0 %v601_v30  ;;  %1259 = vpow2.f32 %v573_v32  ;;  %v916_v30 = vld [vmem:[#allocation4 + $0x18] sm:$0xff] }
 0x416   : > { %v1256_v31 = vpop.eup %1255  ;;  %1197 = vmatprep.subr.bf16.mxu0 %v1299_v0  ;;  %1261 = vpow2.f32 %v712_v33 }
 0x417   : > { %v725_v35 = vsel %vm427_vm7, %v1256_v31, 0.0  ;;  %v732_v36 = vpop.permute.xlu1 %731  ;;  %v730_v40 = vpack.c.bf16 %v1256_v31, %v1256_v31  ;;  %1263 = vpow2.f32 %v433_v46 }
 0x418   : > { %726 = vadd.xlane.f32.xlu0 %v725_v35  ;;  %1188 = vmatmul.mubr.msk.bf16.vlgmr.msra.gmra.mrb[4].mxu0 %vm427_vm7, %v591_v34  ;;  %v737_v37 = vsel %vm455_vm8, %v732_v36, 0  ;;  %1265 = vpow2.f32 %v848_v48 }
 0x419   : > { %1198 = vmatpush3.bf16.msra.mxu0 %v737_v37  ;;  %1199 = vmatprep.mubr.msk.bf16.mxu0 %vm1300_vm1, %v1299_v0 }
 0x41a   : > { %1209 = vmatprep.subr.bf16.mxu0 %v1299_v0 }
 0x41b   : > { %v868_v38 = vpop.permute.xlu1 %867 }
 0x41c   : > { %v873_v41 = vsel %vm455_vm8, %v868_v38, 0 }
 0x41e   : > { %v1258_v39 = vpop.eup %1257 }
 0x41f   : > { %v861_v43 = vsel %vm427_vm7, %v1258_v39, 0.0  ;;  %v1260_v44 = vpop.eup %1259  ;;  %v866_v45 = vpack.c.bf16 %v1258_v39, %v1258_v39 }
 0x420   : > { %862 = vadd.xlane.f32.xlu0 %v861_v43  ;;  %1200 = vmatmul.mubr.msk.bf16.vlgmr.msra.gmra.mrb[8].mxu0 %vm427_vm7, %v730_v40  ;;  %v1262_v47 = vpop.eup %1261 }
 0x421   : > { %1210 = vmatpush3.bf16.msra.mxu0 %v873_v41  ;;  %1211 = vmatprep.mubr.msk.bf16.mxu0 %vm1300_vm1, %v1299_v0  ;;  %v1264_v49 = vpop.eup %1263  ;;  %v585_v0 = vmul.f32 %v1260_v44, %v584_v51  ;;  %v724_v56 = vmul.f32 %v1262_v47, %v723_v25 }
 0x422   : > { %v1266_v50 = vpop.eup %1265  ;;  %v444_v22 = vmul.f32 %v1264_v49, %v443_v53 }
 0x423   : > { %v860_v62 = vmul.f32 %v1266_v50, %v859_v60 }
 0x425   : > { %647 = vperm.xlu1 %1248, %v1260_v44  }
 0x428   : > { %1212 = vmatmul.mubr.msk.bf16.vlgmr.msra.gmra.mrb[12].mxu0 %vm427_vm7, %v866_v45 }
 0x429   : > { %783 = vperm.xlu1 %1248, %v1262_v47  }
 0x436   : > { %502 = vperm.xlu0 %1247, %v1264_v49  }
 0x43a   : > { %919 = vperm.xlu0 %1247, %v1266_v50  }
 0x49d   : > { %v588_v52 = vpop.xlane.xlu1 %587 }
 0x49e   : > { %v589_v54 = vadd.f32 %v588_v52, %v585_v0 }
 0x4a0   : > { %590 = vst.msk [vmem:[#allocation3 + $0x8] sm:$0xff] %vm341_vm2, %v589_v54 }
 0x4a1   : > { %v447_v24 = vpop.xlane.xlu1 %446 }
 0x4a2   : > { %v448_v55 = vadd.f32 %v447_v24, %v444_v22 }
 0x4a4   : > { %450 = vst.msk [vmem:[#allocation3] sm:$0xff] %vm341_vm2, %v448_v55 }
 0x4a5   : > { %v727_v57 = vpop.xlane.xlu0 %726  ;;  %v648_v13 = vpop.permute.xlu1 %647 }
 0x4a6   : > { %v728_v58 = vadd.f32 %v727_v57, %v724_v56  ;;  %v650_v14 = vmul.f32 %v648_v13, %v644_v12 }
 0x4a7   : > { %v938_v59 = vld [vmem:[#allocation3 + $0x8] sm:$0xff] }
 0x4a8   : > { %729 = vst.msk [vmem:[#allocation3 + $0x10] sm:$0xff] %vm341_vm2, %v728_v58  ;;  %1267 = vrcp.f32 %v938_v59 }
 0x4a9   : > { %v784_v21 = vpop.permute.xlu1 %783 }
 0x4ab   : > { %v929_v61 = vld [vmem:[#allocation3] sm:$0xff] }
 0x4ac   : > { %1269 = vrcp.f32 %v929_v61 }
 0x4ad   : > { %v863_v63 = vpop.xlane.xlu0 %862 }
 0x4ae   : > { %v864_v1 = vadd.f32 %v863_v63, %v860_v62 }
 0x4af   : > { %v947_v2 = vld [vmem:[#allocation3 + $0x10] sm:$0xff] }
 0x4b0   : > { %865 = vst.msk [vmem:[#allocation3 + $0x18] sm:$0xff] %vm341_vm2, %v864_v1  ;;  %1271 = vrcp.f32 %v947_v2 }
 0x4b2   : > { %v1268_v3 = vpop.eup %1267 }
 0x4b3   : > { %943 = vperm.xlu0 %1247, %v1268_v3  }
 0x4b5   : > { %v503_v5 = vpop.permute.xlu0 %502 }
 0x4b6   : > { %v1270_v6 = vpop.eup %1269  ;;  %v505_v7 = vmul.f32 %v503_v5, %v499_v4 }
 0x4b7   : > { %934 = vperm.xlu1 %1248, %v1270_v6   ;;  %v956_v8 = vld [vmem:[#allocation3 + $0x18] sm:$0xff] }
 0x4b8   : > { %v506_v9 = vadd.f32 %v505_v7, %v1448_v42  ;;  %1273 = vrcp.f32 %v956_v8  ;;  %v786_v42 = vmul.f32 %v784_v21, %v780_v20 }
 0x4b9   : > { %v920_v31 = vpop.permute.xlu0 %919 }
 0x4ba   : > { %v1272_v10 = vpop.eup %1271  ;;  %507 = vst.msk [vmem:[#allocation4] sm:$0xff] %vm350_vm0, %v506_v9  ;;  %v922_v32 = vmul.f32 %v920_v31, %v916_v30 }
 0x4bb   : > { %952 = vperm.xlu1 %1248, %v1272_v10  }
 0x4c1   : > { %v931_v49 = vld [vmem:[#allocation4] sm:$0xff] }
 0x4c2   : > { %v1274_v11 = vpop.eup %1273 }
 0x4c3   : > { %961 = vperm.xlu0 %1247, %v1274_v11  }
 0x4eb   : > { %v637_v15 = vpop.f32.mrb[4].mxu0 }
 0x4ec   : > { %v651_v16 = vadd.f32 %v650_v14, %v637_v15  ;;  %v1189_v17 = vpop.f32.mrb[5].mxu0 }
 0x4ed   : > { %v640_v18 = vpop.f32.mrb[6].mxu0 }
 0x4ee   : > { %652 = vst.msk [vmem:[#allocation4 + $0x8] sm:$0xff] %vm350_vm0, %v651_v16  ;;  %v1190_v19 = vpop.f32.mrb[7].mxu0 }
 0x4f3   : > { %v773_v23 = vpop.f32.mrb[8].mxu0 }
 0x4f4   : > { %v787_v26 = vadd.f32 %v786_v42, %v773_v23  ;;  %v1201_v27 = vpop.f32.mrb[9].mxu0 }
 0x4f5   : > { %v776_v28 = vpop.f32.mrb[10].mxu0  ;;  %v940_v39 = vld [vmem:[#allocation4 + $0x8] sm:$0xff] }
 0x4f6   : > { %788 = vst.msk [vmem:[#allocation4 + $0x10] sm:$0xff] %vm350_vm0, %v787_v26  ;;  %v1202_v29 = vpop.f32.mrb[11].mxu0 }
 0x4fb   : > { %v909_v34 = vpop.f32.mrb[12].mxu0 }
 0x4fc   : > { %v923_v35 = vadd.f32 %v922_v32, %v909_v34  ;;  %v1213_v36 = vpop.f32.mrb[13].mxu0 }
 0x4fd   : > { %v912_v37 = vpop.f32.mrb[14].mxu0  ;;  %v949_v44 = vld [vmem:[#allocation4 + $0x10] sm:$0xff] }
 0x4fe   : > { %924 = vst.msk [vmem:[#allocation4 + $0x18] sm:$0xff] %vm350_vm0, %v923_v35  ;;  %v1214_v33 = vpop.f32.mrb[15].mxu0 }
 0x505   : > { %v958_v47 = vld [vmem:[#allocation4 + $0x18] sm:$0xff] }
 0x532   : > { %v944_v38 = vpop.permute.xlu0 %943 }
 0x533   : > { %v946_v40 = vmul.f32 %v944_v38, %v940_v39 }
 0x535   : > { %966 = vrot.lane.b32.xlu1 %v946_v40, %s1305_s5 }
 0x536   : > { %v935_v41 = vpop.permute.xlu1 %934 }
 0x537   : > { %v937_v51 = vmul.f32 %v935_v41, %v931_v49 }
 0x53a   : > { %v953_v43 = vpop.permute.xlu1 %952 }
 0x53b   : > { %v955_v45 = vmul.f32 %v953_v43, %v949_v44 }
 0x53d   : > { %970 = vrot.lane.b32.xlu0 %v955_v45, %s1304_s30 }
 0x542   : > { %v962_v46 = vpop.permute.xlu0 %961 }
 0x543   : > { %v964_v48 = vmul.f32 %v962_v46, %v958_v47 }
 0x545   : > { %974 = vrot.lane.b32.xlu1 %v964_v48, %s1303_s29 }
 0x5a7   : > { %v967_v50 = vpop.permute.xlu1 %966 }
 0x5a8   : > { %v977_v52 = vsel %vm350_vm0, %v937_v51, %v967_v50 }
 0x5af   : > { %v971_v0 = vpop.permute.xlu0 %970 }
 0x5b0   : > { %v979_v53 = vsel %vm978_vm9, %v977_v52, %v971_v0 }
 0x5b7   : > { %v975_v54 = vpop.permute.xlu1 %974 }
 0x5b8   : > { %v981_v22 = vsel %vm980_vm10, %v979_v53, %v975_v54 }
 0x5b9   : > { %v982_v24 = vpack.c.bf16 %v981_v22, %v981_v22 }
 0x5bb   : > { %983 = vst [vmem:[%s335_s12] sm:$0xf] %v982_v24 }
 0x5bc PF: > { %s14_s17 = sadd.s32 1, %s1297_s17   ;;  %s1520_s15 = smov %s1293_s16 }
 0x5bd   : > { %p11_p5 = scmp.ge.s32.totalorder %s14_s17, 4   ;;  %s1521_s16 = smov %s1523_s18 }
 0x5bf   :  { %13 = sbr.rel (!%p11_p5) target bundleno = 2 (0x2), region = 92 }

// kernel: decoder_layer_forward.9
= control target key start
LH: loop header
LB: loop body
LE: loop exit
PB: predicated region body
PF: predicated region fallthrough
CT: control target
= control target key end

     0   :  { %s510_s0 = inlined_call_operand.vmem [shape: bf16[16,256], index: 0, kind: input, shape index: {}]   ;;  %s511_s1 = inlined_call_operand.vmem [shape: bf16[256,128], index: 1, kind: input, shape index: {}]   ;;  %s512_s2 = inlined_call_operand.vmem [shape: f32[1,128], index: 2, kind: input, shape index: {}]   ;;  %s513_s3 = inlined_call_operand.vmem [shape: bf16[16,128], index: 3, kind: input, shape index: {}]   ;;  %s514_s4 = inlined_call_operand.vmem [shape: f32[1,128], index: 4, kind: input, shape index: {}]   ;;  %s515_s5 = inlined_call_operand.vmem [shape: f32[1,128], index: 5, kind: input, shape index: {}]   ;;  %s516_s6 = inlined_call_operand.hbm [shape: f32[16,128], index: 6, kind: output, shape index: {}]  }
   0x1   :  { %v347_v0 = vld [vmem:[%s511_s1 + $0x40] sm:$0xff]   ;;  %v349_v2 = vld [vmem:[%s511_s1 + $0x48] sm:$0xff]   ;;  %v351_v4 = vld [vmem:[%s511_s1 + $0x50] sm:$0xff]  }
   0x2   :  { %v348_v1 = vld [vmem:[%s511_s1] sm:$0xff]   ;;  %322 = vmatprep.subr.bf16.mxu0 %v347_v0  ;;  %v350_v3 = vld [vmem:[%s511_s1 + $0x8] sm:$0xff]   ;;  %v352_v5 = vld [vmem:[%s511_s1 + $0x10] sm:$0xff]  }
   0x3   :  { %323 = vmatpush3.bf16.msra.mxu0 %v348_v1  ;;  %v353_v6 = vld [vmem:[%s511_s1 + $0x58] sm:$0xff]   ;;  %v355_v8 = vld [vmem:[%s511_s1 + $0x60] sm:$0xff]   ;;  %v357_v10 = vld [vmem:[%s511_s1 + $0x68] sm:$0xff]  }
   0x4   :  { %324 = vmatprep.subr.bf16.mxu0 %v349_v2  ;;  %v354_v7 = vld [vmem:[%s511_s1 + $0x18] sm:$0xff]   ;;  %v356_v9 = vld [vmem:[%s511_s1 + $0x20] sm:$0xff]  }
   0x5   :  { %v365_v11 = vld [vmem:[%s510_s0 + $0x4] ss:$8 sps:$4 sm:$0xff]  }
   0x7   :  { %325 = vmatpush3.bf16.msra.mxu0 %v350_v3 }
   0x8   :  { %326 = vmatprep.subr.bf16.mxu0 %v351_v4 }
   0xb   :  { %327 = vmatpush3.bf16.msra.mxu0 %v352_v5 }
   0xc   :  { %328 = vmatprep.subr.bf16.mxu0 %v353_v6 }
   0xf   :  { %329 = vmatpush3.bf16.msra.mxu0 %v354_v7 }
  0x10   :  { %330 = vmatprep.subr.bf16.mxu0 %v355_v8 }
  0x11   :  { %11 = vsyncpa [#allocation4], 0  ;;  %v358_v12 = vld [vmem:[%s511_s1 + $0x28] sm:$0xff]   ;;  %205 = vmatprep.mubr.bf16.mxu0 %v365_v11  ;;  %v359_v13 = vld [vmem:[%s511_s1 + $0x70] sm:$0xff]   ;;  %s394_s13 = smov [#allocation3]  }
  0x12   :  { %v360_v14 = vld [vmem:[%s511_s1 + $0x30] sm:$0xff]   ;;  %v361_v15 = vld [vmem:[%s511_s1 + $0x78] sm:$0xff]   ;;  %v363_v17 = vld [vmem:[%s510_s0] ss:$8 sps:$4 sm:$0xff]   ;;  %s286_s14 = sshll.u32 %s394_s13, 4  ;;  %s287_s14 = int_to_ptr.vmem [resolvable:$true] %s286_s14 }
  0x13   :  { %331 = vmatpush3.bf16.msra.mxu0 %v356_v9  ;;  %v362_v16 = vld [vmem:[%s511_s1 + $0x38] sm:$0xff]   ;;  %v319_v18 = vld [vmem:[%s513_s3] sm:$0xff]   ;;  %s370_s15 = scalar_lea.vmem %s287_s14, 256  ;;  %p375_p1 = scmp.lt.s32.totalorder %s287_s14, %s287_s14 }
  0x14   :  { %332 = vmatprep.subr.bf16.mxu0 %v357_v10  ;;  %v315_v21 = vld [vmem:[%s512_s2] ss:$0 sm:$0xff]  ;;  %v320_v24 = vunpack.c.l.bf16 %v319_v18  ;;  %v321_v30 = vunpack.c.h.bf16 %v319_v18  ;;  %p371_p0 = scmp.ne.s32.totalorder %s287_s14, %s370_s15  ;;  %p376_p2 = scmp.lt.s32.totalorder %s370_s15, %s370_s15 }
  0x15   :  { %v316_v47 = vld [vmem:[%s514_s4] ss:$0 sm:$0xff] }
  0x16   :  { %v317_v49 = vld [vmem:[%s515_s5] ss:$0 sm:$0xff]  ;;  %p377_p3 = por %p376_p2, %p375_p1 }
  0x17   :  { %333 = vmatpush3.bf16.msra.mxu0 %v358_v12 }
  0x18   :  { %334 = vmatprep.subr.bf16.mxu0 %v359_v13  ;;  %p378_p4 = pnand %p377_p3, %p371_p0 }
  0x1b   :  { %335 = vmatpush3.bf16.msra.mxu0 %v360_v14 }
  0x1c   :  { %336 = vmatprep.subr.bf16.mxu0 %v361_v15 }
  0x1f   :  { %337 = vmatpush3.bf16.msra.mxu0 %v362_v16 }
  0x22   :  { %206 = vmatmul.mubr.bf16.vlgmr.msra.gmra.mrb[0].mxu0 %v363_v17 }
  0xf5   :  { %v338_v19 = vpop.f32.mrb[0].mxu0 }
  0xf6   :  { %v339_v20 = vpop.f32.mrb[1].mxu0 }
  0xf7   :  { %v340_v22 = vadd.f32 %v339_v20, %v338_v19  ;;  %v341_v23 = vpop.f32.mrb[2].mxu0 }
  0xf8   :  { %v342_v25 = vpop.f32.mrb[3].mxu0 }
  0xf9   :  { %v230_v26 = vadd.f32 %v340_v22, %v315_v21  ;;  %v343_v27 = vadd.f32 %v342_v25, %v341_v23 }
  0xfb   :  { %v231_v28 = vadd.f32 %v343_v27, %v315_v21  ;;  %v236_v29 = vadd.f32 %v320_v24, %v230_v26 }
  0xfd   :  { %238 = vadd.xlane.f32.xlu0 %v236_v29  ;;  %v237_v31 = vadd.f32 %v321_v30, %v231_v28 }
 0x101   :  { %240 = vadd.xlane.f32.xlu0 %v237_v31 }
 0x18a   :  { %v239_v32 = vpop.xlane.xlu0 %238 }
 0x18b   :  { %v243_v33 = vmul.f32 0.0078125, %v239_v32 }
 0x18d   :  { %v245_v34 = vsub.f32 %v236_v29, %v243_v33 }
 0x18e   :  { %v241_v35 = vpop.xlane.xlu0 %240 }
 0x18f   :  { %v244_v36 = vmul.f32 0.0078125, %v241_v35  ;;  %v247_v37 = vmul.f32 %v245_v34, %v245_v34 }
 0x191   :  { %v246_v38 = vsub.f32 %v237_v31, %v244_v36  ;;  %249 = vadd.xlane.f32.xlu1 %v247_v37 }
 0x193   :  { %v248_v39 = vmul.f32 %v246_v38, %v246_v38 }
 0x195   :  { %251 = vadd.xlane.f32.xlu1 %v248_v39 }
 0x21e   :  { %v250_v40 = vpop.xlane.xlu1 %249 }
 0x21f   :  { %v253_v41 = vmul.f32 0.0078125, %v250_v40 }
 0x221   :  { %v255_v42 = vadd.f32 1e-06, %v253_v41 }
 0x222   :  { %v252_v43 = vpop.xlane.xlu1 %251 }
 0x223   :  { %366 = vrsqrt.f32 %v255_v42  ;;  %v254_v44 = vmul.f32 0.0078125, %v252_v43 }
 0x225   :  { %v256_v45 = vadd.f32 1e-06, %v254_v44 }
 0x227   :  { %368 = vrsqrt.f32 %v256_v45 }
 0x22d   :  { %v367_v46 = vpop.eup %366 }
 0x22e   :  { %v259_v48 = vmul.f32 %v367_v46, %v245_v34 }
 0x230   :  { %v268_v50 = vmul.f32 %v316_v47, %v259_v48 }
 0x231   :  { %v369_v51 = vpop.eup %368 }
 0x232   :  { %v260_v52 = vmul.f32 %v369_v51, %v246_v38  ;;  %v277_v53 = vadd.f32 %v317_v49, %v268_v50 }
 0x234   :  { %v269_v54 = vmul.f32 %v316_v47, %v260_v52  ;;  %279 = vst [vmem:[#allocation3] sm:$0xff] %v277_v53 }
 0x236   :  { %v278_v55 = vadd.f32 %v317_v49, %v269_v54 }
 0x238   :  { %280 = vst [vmem:[#allocation3 + $0x8] sm:$0xff] %v278_v55 }
 0x239   :  { %381 = shalt.err (!%p378_p4)
}
 0x23a   :  { %s382_s16 = scalar_lea.hbm %s516_s6, 256 }
 0x23b   :  { %p383_p5 = scmp.ne.s32.totalorder %s516_s6, %s382_s16  ;;  %p386_p6 = scmp.lt.u32.totalorder %s382_s16, %s516_s6 }
 0x23d   :  { %p388_p7 = pnand %p386_p6, %p383_p5 }
 0x23f   :  { %391 = shalt.err (!%p388_p7)
}
 0x240   :  { %s395_s21 = smov 128   ;;  %s396_s22 = smov 8  }
 0x241   :  { %292 = dma.vmem_to_hbm [thread:$0]  %s287_s14, 256, %s516_s6, [#allocation4], %s395_s21, %s395_s21, %s396_s22  }
 0x242   :  { %392 = dma.done.wait [#allocation4], 256  }
 0x243   :  { %393 = vsyncadd [#allocation4], 4294967040 }
 0x244   :  { %296 = vsyncpa [#allocation4], 1 }

</bundles_post_ra>
